<compile_context>
chip_gen: v6e
topology: v6e:2x2x1
jax: 0.10.0
libtpu: 0.0.40
codegen_flags: <defaults>
</compile_context>

<pallas_src>
import functools

import jax
import jax.numpy as jnp
from jax.experimental import pallas as pl
from jax.experimental.pallas import tpu as pltpu

_LANE = 128


def _masked_mse_kernel(pred_ref, tgt_ref, lbl_ref, sum_ref, cnt_ref, *,
                       feat_dim, n_points, ignore_index, use_ignore):
    i = pl.program_id(0)
    tile_rows, gd = pred_ref.shape          # gd = 128 * feat_dim (lane-dense)
    group = gd // feat_dim                  # = 128 original points per row

    p = pred_ref[...].astype(jnp.float32)   # (TR, 128*D)
    t = tgt_ref[...].astype(jnp.float32)
    d = p - t
    sq = d * d

    # Sum each point's D squared diffs with one MXU matmul:
    #   E[j, g] = 1.0  iff lane j belongs to point g  (g*D <= j < (g+1)*D).
    # TODO(synk): for very wide D (>= 128) a non-folded layout would be used
    #             instead of this grouping matrix.
    j_iota = jax.lax.broadcasted_iota(jnp.int32, (gd, group), 0)
    g_iota = jax.lax.broadcasted_iota(jnp.int32, (gd, group), 1)
    e = ((j_iota >= g_iota * feat_dim) &
         (j_iota < (g_iota + 1) * feat_dim)).astype(jnp.float32)
    per_point = jnp.dot(sq, e, preferred_element_type=jnp.float32,
                        precision=jax.lax.Precision.HIGHEST)     # (TR, 128)

    # Validity mask: in-range point (handles wrapper padding and the partial
    # last grid tile) and, optionally, segment label != ignore_index.
    r_iota = jax.lax.broadcasted_iota(jnp.int32, (tile_rows, group), 0)
    c_iota = jax.lax.broadcasted_iota(jnp.int32, (tile_rows, group), 1)
    point_idx = (i * tile_rows + r_iota) * group + c_iota
    valid = point_idx < n_points
    if use_ignore:
        valid = valid & (lbl_ref[...] != ignore_index)

    partial_sum = jnp.sum(jnp.where(valid, per_point, 0.0))
    partial_cnt = jnp.sum(valid.astype(jnp.float32)) * jnp.float32(feat_dim)
    sum_ref[...] = partial_sum.reshape(1, 1, 1)
    cnt_ref[...] = partial_cnt.reshape(1, 1, 1)


def mse_loss(pred, target, segment_target=None, *, ignore_index=None,
             loss_weight=1.0, vmem_budget_bytes=2 * 1024 * 1024):
    """Masked MSE: mean((pred - target)**2 over rows with seg != ignore) * w."""
    pred = jnp.asarray(pred)
    target = jnp.asarray(target)
    if pred.ndim == 1:
        pred = pred[:, None]
        target = target[:, None]
    n_points, feat_dim = pred.shape

    use_ignore = (ignore_index is not None) and (segment_target is not None)
    if use_ignore:
        labels = jnp.asarray(segment_target, dtype=jnp.int32)
        ign = int(ignore_index)
    else:
        labels = jnp.zeros((n_points,), dtype=jnp.int32)
        ign = 0

    # Pad the point axis to a multiple of 128 so points fold exactly onto the
    # lane axis (no-op when N is already aligned; padded rows are masked
    # in-kernel, so the pad contents are irrelevant).
    pad = (-n_points) % _LANE
    if pad:
        pred = jnp.pad(pred, ((0, pad), (0, 0)))
        target = jnp.pad(target, ((0, pad), (0, 0)))
        labels = jnp.pad(labels, (0, pad), constant_values=ign)
    rows = (n_points + pad) // _LANE
    gd = _LANE * feat_dim

    pred2 = pred.reshape(rows, gd)          # zero-cost row-major reshapes
    tgt2 = target.reshape(rows, gd)
    lbl2 = labels.reshape(rows, _LANE)      # lane-dense labels

    # Tile sizing: ~vmem_budget_bytes per (array, buffer); round to sublane
    # multiple (or take the full array if it already fits).
    itemsize = pred2.dtype.itemsize
    tile_rows = max(8, vmem_budget_bytes // (gd * itemsize))
    if tile_rows >= rows:
        tile_rows = rows
    else:
        tile_rows = (tile_rows // 8) * 8
    num_tiles = -(-rows // tile_rows)

    kernel = functools.partial(
        _masked_mse_kernel, feat_dim=feat_dim, n_points=n_points,
        ignore_index=ign, use_ignore=use_ignore)

    sums, counts = pl.pallas_call(
        kernel,
        out_shape=(jax.ShapeDtypeStruct((num_tiles, 1, 1), jnp.float32),
                   jax.ShapeDtypeStruct((num_tiles, 1, 1), jnp.float32)),
        grid_spec=pltpu.PrefetchScalarGridSpec(
            num_scalar_prefetch=0,
            grid=(num_tiles,),
            in_specs=[
                pl.BlockSpec((tile_rows, gd), lambda i: (i, 0)),
                pl.BlockSpec((tile_rows, gd), lambda i: (i, 0)),
                pl.BlockSpec((tile_rows, _LANE), lambda i: (i, 0)),
            ],
            out_specs=[
                pl.BlockSpec((1, 1, 1), lambda i: (i, 0, 0)),
                pl.BlockSpec((1, 1, 1), lambda i: (i, 0, 0)),
            ],
        ),
        compiler_params=pltpu.CompilerParams(
            dimension_semantics=("parallel",),
            vmem_limit_bytes=32 * 1024 * 1024),
    )(pred2, tgt2, lbl2)

    total = jnp.sum(sums)
    count = jnp.sum(counts)
    # NOTE: if every point is ignored this divides by zero (NaN), matching the
    # reference behaviour (torch .mean() of an empty tensor is NaN).
    return (total / count) * jnp.float32(loss_weight)


def _reference_mse_loss(pred, target, segment_target=None, ignore_index=None,
                        loss_weight=1.0):
    pred = pred.astype(jnp.float32)
    target = target.astype(jnp.float32)
    sq = (pred - target) ** 2
    if ignore_index is not None and segment_target is not None:
        valid = segment_target != ignore_index
        sq = jnp.where(valid[:, None], sq, 0.0)
        denom = valid.sum() * pred.shape[1]
    else:
        denom = pred.size
    return sq.sum() / denom * loss_weight


if __name__ == "__main__":
    key = jax.random.PRNGKey(0)
    k1, k2, k3 = jax.random.split(key, 3)
    # Small point-cloud-like shapes: 500 points, 3-dim regression feature
    # (e.g. color/normal).  N is deliberately not a multiple of 128 to
    # exercise the in-kernel ragged-N masking.
    n, d = 500, 3
    pred = jax.random.normal(k1, (n, d), dtype=jnp.float32)
    target = jax.random.normal(k2, (n, d), dtype=jnp.float32)
    seg = jax.random.randint(k3, (n,), -1, 20, dtype=jnp.int32)  # -1 -> ignored

    # ignore_index path (segment-masked mean)
    loss = jax.block_until_ready(
        mse_loss(pred, target, seg, ignore_index=-1, loss_weight=1.0))
    ref = _reference_mse_loss(pred, target, seg, ignore_index=-1,
                              loss_weight=1.0)
    assert jnp.allclose(loss, ref, rtol=1e-5, atol=1e-6), (loss, ref)

    # ignore_index=None path (plain mean, scaled)
    loss2 = jax.block_until_ready(
        mse_loss(pred, target, None, ignore_index=None, loss_weight=0.5))
    ref2 = _reference_mse_loss(pred, target, None, ignore_index=None,
                               loss_weight=0.5)
    assert jnp.allclose(loss2, ref2, rtol=1e-5, atol=1e-6), (loss2, ref2)

    print("KERNEL_OK")
</pallas_src>

<mosaic_0001>
module attributes {stable_mosaic.version = 11 : i64} {
  func.func @_masked_mse_kernel(%arg0: i32, %arg1: memref<4x384xf32, #tpu.memory_space<vmem>>, %arg2: memref<4x384xf32, #tpu.memory_space<vmem>>, %arg3: memref<4x128xi32, #tpu.memory_space<vmem>>, %arg4: memref<1x1x1xf32, #tpu.memory_space<vmem>>, %arg5: memref<1x1x1xf32, #tpu.memory_space<vmem>>) attributes {dimension_semantics = [#tpu.dimension_semantics<parallel>], iteration_bounds = array<i64: 1>, scalar_prefetch = 0 : i64, scratch_operands = 0 : i64, tpu.core_type = #tpu.core_type<tc>, window_params = [{transform_indices = @transform_0, window_bounds = array<i64: 4, 384>}, {transform_indices = @transform_1, window_bounds = array<i64: 4, 384>}, {transform_indices = @transform_2, window_bounds = array<i64: 4, 128>}, {transform_indices = @transform_3, window_bounds = array<i64: 1, 1, 1>}, {transform_indices = @transform_4, window_bounds = array<i64: 1, 1, 1>}]} {
    %c0 = arith.constant 0 : index
    %c0_0 = arith.constant 0 : index
    %0 = vector.load %arg1[%c0, %c0_0] : memref<4x384xf32, #tpu.memory_space<vmem>>, vector<4x384xf32>
    %c0_1 = arith.constant 0 : index
    %c0_2 = arith.constant 0 : index
    %1 = vector.load %arg2[%c0_1, %c0_2] : memref<4x384xf32, #tpu.memory_space<vmem>>, vector<4x384xf32>
    %2 = arith.subf %0, %1 : vector<4x384xf32>
    %3 = arith.mulf %2, %2 : vector<4x384xf32>
    %4 = tpu.iota {dimensions = array<i32: 0>} : vector<384x128xi32>
    %5 = tpu.iota {dimensions = array<i32: 1>} : vector<384x128xi32>
    %c3_i32 = arith.constant 3 : i32
    %6 = vector.broadcast %c3_i32 : i32 to vector<384x128xi32>
    %7 = arith.muli %5, %6 : vector<384x128xi32>
    %8 = arith.cmpi sge, %4, %7 : vector<384x128xi32>
    %c1_i32 = arith.constant 1 : i32
    %9 = vector.broadcast %c1_i32 : i32 to vector<384x128xi32>
    %10 = arith.addi %5, %9 : vector<384x128xi32>
    %c3_i32_3 = arith.constant 3 : i32
    %11 = vector.broadcast %c3_i32_3 : i32 to vector<384x128xi32>
    %12 = arith.muli %10, %11 : vector<384x128xi32>
    %13 = arith.cmpi slt, %4, %12 : vector<384x128xi32>
    %14 = arith.andi %8, %13 : vector<384x128xi1>
    %15 = arith.extui %14 : vector<384x128xi1> to vector<384x128xi32>
    %16 = arith.sitofp %15 : vector<384x128xi32> to vector<384x128xf32>
    %cst = arith.constant dense<0.000000e+00> : vector<4x128xf32>
    %17 = tpu.matmul %3, %16, %cst {dimension_numbers = #tpu.dot_dimension_numbers<[1], [0], [0], [1], [0, 0, 1, 1], [], []>, precision = #tpu.contract_precision<fp32>} : vector<4x384xf32>, vector<384x128xf32>, vector<4x128xf32> -> vector<4x128xf32>
    %18 = tpu.iota {dimensions = array<i32: 0>} : vector<4x128xi32>
    %19 = tpu.iota {dimensions = array<i32: 1>} : vector<4x128xi32>
    %c4_i32 = arith.constant 4 : i32
    %20 = arith.muli %arg0, %c4_i32 : i32
    %21 = vector.broadcast %20 : i32 to vector<4x128xi32>
    %22 = arith.addi %21, %18 : vector<4x128xi32>
    %c128_i32 = arith.constant 128 : i32
    %23 = vector.broadcast %c128_i32 : i32 to vector<4x128xi32>
    %24 = arith.muli %22, %23 : vector<4x128xi32>
    %25 = arith.addi %24, %19 : vector<4x128xi32>
    %c500_i32 = arith.constant 500 : i32
    %26 = vector.broadcast %c500_i32 : i32 to vector<4x128xi32>
    %27 = arith.cmpi slt, %25, %26 : vector<4x128xi32>
    %c0_4 = arith.constant 0 : index
    %c0_5 = arith.constant 0 : index
    %28 = vector.load %arg3[%c0_4, %c0_5] : memref<4x128xi32, #tpu.memory_space<vmem>>, vector<4x128xi32>
    %c-1_i32 = arith.constant -1 : i32
    %29 = vector.broadcast %c-1_i32 : i32 to vector<4x128xi32>
    %30 = arith.cmpi ne, %28, %29 : vector<4x128xi32>
    %31 = arith.andi %27, %30 : vector<4x128xi1>
    %cst_6 = arith.constant 0.000000e+00 : f32
    %32 = vector.broadcast %cst_6 : f32 to vector<4x128xf32>
    %33 = arith.select %31, %17, %32 : vector<4x128xi1>, vector<4x128xf32>
    %34 = vector.shape_cast %33 : vector<4x128xf32> to vector<1x4x128xf32>
    %cst_7 = arith.constant dense<0.000000e+00> : vector<1xf32>
    %35 = vector.multi_reduction <add>, %34, %cst_7 [1, 2] : vector<1x4x128xf32> to vector<1xf32>
    %36 = vector.shape_cast %35 : vector<1xf32> to vector<1x1x1xf32>
    %37 = vector.extract %36[0, 0, 0] : f32 from vector<1x1x1xf32>
    %38 = arith.extui %31 : vector<4x128xi1> to vector<4x128xi32>
    %39 = arith.sitofp %38 : vector<4x128xi32> to vector<4x128xf32>
    %40 = vector.shape_cast %39 : vector<4x128xf32> to vector<1x4x128xf32>
    %cst_8 = arith.constant dense<0.000000e+00> : vector<1xf32>
    %41 = vector.multi_reduction <add>, %40, %cst_8 [1, 2] : vector<1x4x128xf32> to vector<1xf32>
    %42 = vector.shape_cast %41 : vector<1xf32> to vector<1x1x1xf32>
    %43 = vector.extract %42[0, 0, 0] : f32 from vector<1x1x1xf32>
    %cst_9 = arith.constant 3.000000e+00 : f32
    %44 = arith.mulf %43, %cst_9 : f32
    %45 = vector.broadcast %37 : f32 to vector<1x1x1xf32>
    %c0_10 = arith.constant 0 : index
    %c0_11 = arith.constant 0 : index
    %c0_12 = arith.constant 0 : index
    %46 = vector.load %arg4[%c0_10, %c0_11, %c0_12] : memref<1x1x1xf32, #tpu.memory_space<vmem>>, vector<1x1x1xf32>
    tpu.vector_store %arg4[%c0_10, %c0_11, %c0_12], %45 {strides = array<i32>} : memref<1x1x1xf32, #tpu.memory_space<vmem>>, vector<1x1x1xf32>,
    %47 = vector.broadcast %44 : f32 to vector<1x1x1xf32>
    %c0_13 = arith.constant 0 : index
    %c0_14 = arith.constant 0 : index
    %c0_15 = arith.constant 0 : index
    %48 = vector.load %arg5[%c0_13, %c0_14, %c0_15] : memref<1x1x1xf32, #tpu.memory_space<vmem>>, vector<1x1x1xf32>
    tpu.vector_store %arg5[%c0_13, %c0_14, %c0_15], %47 {strides = array<i32>} : memref<1x1x1xf32, #tpu.memory_space<vmem>>, vector<1x1x1xf32>,
    return
  }
  func.func @transform_0(%arg0: i32) -> (i32, i32) {
    %c0_i32 = arith.constant 0 : i32
    %c0_i32_0 = arith.constant 0 : i32
    return %arg0, %c0_i32 : i32, i32
  }
  func.func @transform_1(%arg0: i32) -> (i32, i32) {
    %c0_i32 = arith.constant 0 : i32
    %c0_i32_0 = arith.constant 0 : i32
    return %arg0, %c0_i32 : i32, i32
  }
  func.func @transform_2(%arg0: i32) -> (i32, i32) {
    %c0_i32 = arith.constant 0 : i32
    %c0_i32_0 = arith.constant 0 : i32
    return %arg0, %c0_i32 : i32, i32
  }
  func.func @transform_3(%arg0: i32) -> (i32, i32, i32) {
    %c0_i32 = arith.constant 0 : i32
    %c0_i32_0 = arith.constant 0 : i32
    %c0_i32_1 = arith.constant 0 : i32
    return %arg0, %c0_i32, %c0_i32_0 : i32, i32, i32
  }
  func.func @transform_4(%arg0: i32) -> (i32, i32, i32) {
    %c0_i32 = arith.constant 0 : i32
    %c0_i32_0 = arith.constant 0 : i32
    %c0_i32_1 = arith.constant 0 : i32
    return %arg0, %c0_i32, %c0_i32_0 : i32, i32, i32
  }
}

</mosaic_0001>

<bundles_post_ra>
// kernel: tpu_custom_call.1
= control target key start
LH: loop header
LB: loop body
LE: loop exit
PB: predicated region body
PF: predicated region fallthrough
CT: control target
= control target key end

     0   :  { %10 = vsyncpa [#allocation3], 0  ;;  %s4417_s0 = inlined_call_operand.hbm [shape: f32[4,384], index: 0, kind: input, shape index: {}]   ;;  %s4418_s1 = inlined_call_operand.hbm [shape: f32[4,384], index: 1, kind: input, shape index: {}]   ;;  %s4419_s2 = inlined_call_operand.hbm [shape: s32[4,128], index: 2, kind: input, shape index: {}]   ;;  %s4420_s3 = inlined_call_operand.hbm [shape: f32[1,1,1], index: 3, kind: output, shape index: {0}]   ;;  %s4421_s4 = inlined_call_operand.hbm [shape: f32[1,1,1], index: 4, kind: output, shape index: {1}]  }
   0x1   :  { %11 = vsyncpa [#allocation6], 0 }
   0x2   :  { %12 = vsyncpa [#allocation4], 0 }
   0x3   :  { %13 = vsyncpa [#allocation10], 0  ;;  %s2765_s15 = smov [#allocation5]   ;;  %s2766_s17 = smov [#allocation2]  }
   0x4   :  { %s30_s16 = sshll.u32 %s2765_s15, 4  ;;  %s20_s18 = sshll.u32 %s2766_s17, 4  ;;  %s31_s16 = int_to_ptr.vmem [resolvable:$true] %s30_s16  ;;  %s21_s18 = int_to_ptr.vmem [resolvable:$true] %s20_s18 }
   0x5   :  { %s2665_s19 = scalar_lea.vmem %s31_s16, 192  ;;  %p2670_p1 = scmp.lt.s32.totalorder %s31_s16, %s31_s16 }
   0x6   :  { %p2666_p0 = scmp.ne.s32.totalorder %s31_s16, %s2665_s19  ;;  %p2671_p2 = scmp.lt.s32.totalorder %s2665_s19, %s2665_s19 }
   0x8   :  { %p2672_p3 = por %p2671_p2, %p2670_p1 }
   0xa   :  { %p2673_p4 = pnand %p2672_p3, %p2666_p0 }
   0xc   :  { %2676 = shalt.err (!%p2673_p4)
}
   0xd   :  { %33 = dma.hbm_to_vmem [thread:$0]  %s4418_s1, 192, %s31_s16, [#allocation6]  }
   0xe   :  { %s2685_s22 = scalar_lea.vmem %s21_s18, 192  ;;  %p2690_p6 = scmp.lt.s32.totalorder %s21_s18, %s21_s18 }
   0xf   :  { %p2686_p5 = scmp.ne.s32.totalorder %s21_s18, %s2685_s22  ;;  %p2691_p7 = scmp.lt.s32.totalorder %s2685_s22, %s2685_s22 }
  0x11   :  { %p2692_p8 = por %p2691_p7, %p2690_p6 }
  0x13   :  { %p2693_p9 = pnand %p2692_p8, %p2686_p5 }
  0x15   :  { %2696 = shalt.err (!%p2693_p9)
}
  0x16   :  { %23 = dma.hbm_to_vmem [thread:$0]  %s4417_s0, 192, %s21_s18, [#allocation3]  }
  0x17   :  { %s2767_s25 = smov [#allocation7]  }
  0x18   :  { %s40_s26 = sshll.u32 %s2767_s25, 4  ;;  %s41_s26 = int_to_ptr.vmem [resolvable:$true] %s40_s26 }
  0x19   :  { %s2705_s27 = scalar_lea.vmem %s41_s26, 64  ;;  %p2710_p11 = scmp.lt.s32.totalorder %s41_s26, %s41_s26 }
  0x1a   :  { %p2706_p10 = scmp.ne.s32.totalorder %s41_s26, %s2705_s27  ;;  %p2711_p12 = scmp.lt.s32.totalorder %s2705_s27, %s2705_s27 }
  0x1c   :  { %p2712_p13 = por %p2711_p12, %p2710_p11 }
  0x1e   :  { %p2713_p0 = pnand %p2712_p13, %p2706_p10 }
  0x20   :  { %2716 = shalt.err (!%p2713_p0)
}
  0x21   :  { %43 = dma.hbm_to_vmem [thread:$0]  %s4419_s2, 64, %s41_s26, [#allocation6]  }
  0x22   :  { %2757 = dma.done.wait [#allocation3], 192  }
  0x23   :  { %2758 = vsyncadd [#allocation3], 4294967104  ;;  %v61_v0 = vlaneseq }
  0x24   :  { %2759 = dma.done.wait [#allocation6], 256  }
  0x25   :  { %2760 = vsyncadd [#allocation6], 4294967040  ;;  %v2807_v1 = vshrl.u32 %v61_v0, 7  ;;  %v2809_v2 = vand.u32 127, %v61_v0  ;;  %v4481_v14 = vmov 1.0   ;;  %v4459_v19 = vmov 0.0  }
  0x26   :  { %v4583_v45 = vmov 0  ;;  %v4586_v48 = vmov 0  ;;  %v4588_v53 = vmov 0  ;;  %v4590_v59 = vmov 0  ;;  %s2771_s0 = smov [#allocation8]   ;;  %s2772_s30 = smov [#allocation9]  }
  0x27   :  { %4562 = vst [vmem:[#allocation15_spill] sm:$0xff] %v2807_v1  ;;  %4563 = vst [vmem:[#allocation16_spill] sm:$0xff] %v2809_v2  ;;  %v93_v3 = vadd.s32 248, %v2807_v1  ;;  %v2813_v4 = vmul.u32 3, %v2809_v2  ;;  %v161_v5 = vadd.s32 1, %v2809_v2  ;;  %v77_v6 = vadd.s32 120, %v2807_v1 }
  0x28   :  { %v92_v7 = vadd.s32 240, %v2807_v1  ;;  %v76_v8 = vadd.s32 112, %v2807_v1  ;;  %v91_v9 = vadd.s32 232, %v2807_v1  ;;  %v75_v10 = vadd.s32 104, %v2807_v1  ;;  %s1906_s2 = sshll.u32 %s2771_s0, 4  ;;  %s1916_s5 = sshll.u32 %s2772_s30, 4  ;;  %s1907_s2 = int_to_ptr.vmem [resolvable:$true] %s1906_s2  ;;  %s1917_s5 = int_to_ptr.vmem [resolvable:$true] %s1916_s5 }
  0x29   :  { %4564 = vst [vmem:[#allocation17_spill] sm:$0xff] %v2813_v4  ;;  %vm144_vm0 = vcmp.ge.s32.totalorder %v93_v3, %v2813_v4  ;;  %v2822_v11 = vmul.u32 3, %v161_v5  ;;  %vm128_vm1 = vcmp.ge.s32.totalorder %v77_v6, %v2813_v4  ;;  %v90_v12 = vadd.s32 224, %v2807_v1  ;;  %s2717_s6 = scalar_lea.vmem %s1907_s2, 16  ;;  %s2721_s7 = scalar_lea.vmem %s1907_s2, 32 }
  0x2a   :  { %vm143_vm2 = vcmp.ge.s32.totalorder %v92_v7, %v2813_v4  ;;  %vm127_vm3 = vcmp.ge.s32.totalorder %v76_v8, %v2813_v4  ;;  %vm142_vm4 = vcmp.ge.s32.totalorder %v91_v9, %v2813_v4  ;;  %vm126_vm5 = vcmp.ge.s32.totalorder %v75_v10, %v2813_v4  ;;  %p2718_p1 = scmp.ne.s32.totalorder %s1907_s2, %s2717_s6  ;;  %p2722_p2 = scmp.lt.s32.totalorder %s1907_s2, %s1907_s2 }
  0x2b   :  { %4565 = vst [vmem:[#allocation18_spill] sm:$0xff] %v2822_v11  ;;  %vm194_vm6 = vcmp.lt.s32.totalorder %v93_v3, %v2822_v11  ;;  %vm178_vm7 = vcmp.lt.s32.totalorder %v77_v6, %v2822_v11  ;;  %vm193_vm8 = vcmp.lt.s32.totalorder %v92_v7, %v2822_v11  ;;  %vm177_vm9 = vcmp.lt.s32.totalorder %v76_v8, %v2822_v11  ;;  %p2723_p3 = scmp.lt.s32.totalorder %s2721_s7, %s2717_s6 }
  0x2c   :  { %vm2834_vm10 = vmand %vm144_vm0, %vm194_vm6  ;;  %vm192_vm11 = vcmp.lt.s32.totalorder %v91_v9, %v2822_v11  ;;  %vm176_vm12 = vcmp.lt.s32.totalorder %v75_v10, %v2822_v11  ;;  %vm141_vm13 = vcmp.ge.s32.totalorder %v90_v12, %v2813_v4  ;;  %vm191_vm14 = vcmp.lt.s32.totalorder %v90_v12, %v2822_v11 }
  0x2d   :  { %2123 = vmatprep.subr.msk.mxu0 %vm2834_vm10, %v4481_v14  ;;  %vm2847_vm15 = vmand %vm128_vm1, %vm178_vm7  ;;  %v74_v16 = vadd.s32 96, %v2807_v1  ;;  %v89_v17 = vadd.s32 216, %v2807_v1  ;;  %v73_v18 = vadd.s32 88, %v2807_v1  ;;  %v1961_v20 = vsel %vm2834_vm10, 1.0, %v4459_v19  ;;  %p2724_p4 = por %p2723_p3, %p2722_p2 }
  0x2e   :  { %2124 = vmatpush3.msk.msra.mxu0 %vm2847_vm15, %v4481_v14  ;;  %vm2864_vm0 = vmand %vm143_vm2, %vm193_vm8  ;;  %v2868_v22 = vsub.f32 %v1961_v20, %v1961_v20  ;;  %v88_v23 = vadd.s32 208, %v2807_v1  ;;  %v1945_v24 = vsel %vm2847_vm15, 1.0, %v4459_v19  ;;  %v72_v25 = vadd.s32 80, %v2807_v1  ;;  %v4712_v30 = vld [vmem:[#allocation15_spill] sm:$0xff] }
  0x2f   :  { %v1960_v26 = vsel %vm2864_vm0, 1.0, %v4459_v19  ;;  %2125 = vmatprep.subr.msk.mxu0 %vm2864_vm0, %v4481_v14  ;;  %vm2885_vm1 = vmand %vm127_vm3, %vm177_vm9  ;;  %vm125_vm2 = vcmp.ge.s32.totalorder %v74_v16, %v2813_v4  ;;  %vm175_vm6 = vcmp.lt.s32.totalorder %v74_v16, %v2822_v11  ;;  %vm140_vm7 = vcmp.ge.s32.totalorder %v89_v17, %v2813_v4  ;;  %p2725_p5 = pnand %p2724_p4, %p2718_p1 }
  0x30   :  { %4572 = vst [vmem:[#allocation19_spill] sm:$0xff] %v2868_v22  ;;  %v2892_v28 = vsub.f32 %v1960_v26, %v1960_v26  ;;  %v1944_v29 = vsel %vm2885_vm1, 1.0, %v4459_v19  ;;  %2126 = vmatpush3.msk.msra.mxu0 %vm2885_vm1, %v4481_v14  ;;  %vm2904_vm3 = vmand %vm142_vm4, %vm192_vm11  ;;  %vm190_vm8 = vcmp.lt.s32.totalorder %v89_v17, %v2822_v11  ;;  %vm174_vm11 = vcmp.lt.s32.totalorder %v73_v18, %v2822_v11 }
  0x31   :  { %v2910_v31 = vsub.f32 %v1944_v29, %v1944_v29  ;;  %v1959_v32 = vsel %vm2904_vm3, 1.0, %v4459_v19  ;;  %2127 = vmatprep.subr.msk.mxu0 %vm2904_vm3, %v4481_v14  ;;  %vm2922_vm4 = vmand %vm126_vm5, %vm176_vm12  ;;  %v4456_v34 = vand.u32 4294901760, %v2868_v22  ;;  %vm139_vm12 = vcmp.ge.s32.totalorder %v88_v23, %v2813_v4 }
  0x32   :  { %v2928_v35 = vsub.f32 %v1959_v32, %v1959_v32  ;;  %v1943_v36 = vsel %vm2922_vm4, 1.0, %v4459_v19  ;;  %2128 = vmatpush3.msk.msra.mxu0 %vm2922_vm4, %v4481_v14  ;;  %vm2940_vm5 = vmand %vm141_vm13, %vm191_vm14  ;;  %vm189_vm9 = vcmp.lt.s32.totalorder %v88_v23, %v2822_v11  ;;  %v2965_v42 = vsub.f32 %v1945_v24, %v1945_v24 }
  0x33   :  { %v2946_v38 = vsub.f32 %v1943_v36, %v1943_v36  ;;  %v1958_v39 = vsel %vm2940_vm5, 1.0, %v4459_v19  ;;  %2129 = vmatprep.subr.msk.mxu0 %vm2940_vm5, %v4481_v14  ;;  %vm2958_vm13 = vmand %vm125_vm2, %vm175_vm6  ;;  %v586_v41 = vsub.f32 %v2868_v22, %v4456_v34  ;;  %vm123_vm2 = vcmp.ge.s32.totalorder %v72_v25, %v2813_v4 }
  0x34   :  { %v2967_v43 = vsub.f32 %v1958_v39, %v1958_v39  ;;  %v1942_v44 = vsel %vm2958_vm13, 1.0, %v4459_v19  ;;  %2130 = vmatpush3.msk.msra.mxu0 %vm2958_vm13, %v4481_v14  ;;  %vm2979_vm14 = vmand %vm140_vm7, %vm190_vm8  ;;  %vm173_vm6 = vcmp.lt.s32.totalorder %v72_v25, %v2822_v11  ;;  %vm4585_vm7 = vcmp.ge.s32.totalorder %v73_v18, %v2813_v4 }
  0x35   :  { %v4584_v45 = vsel %vm2979_vm14, 4294967295, %v4583_v45  ;;  %v2985_v46 = vsub.f32 %v1942_v44, %v1942_v44  ;;  %v1957_v47 = vsel %vm2979_vm14, 1.0, %v4459_v19  ;;  %2131 = vmatprep.subr.msk.mxu0 %vm2979_vm14, %v4481_v14  ;;  %vm2997_vm8 = vmand %vm4585_vm7, %vm174_vm11  ;;  %v587_v49 = vand.u32 4294901760, %v586_v41 }
  0x36   :  { %v4587_v48 = vsel %vm2997_vm8, 4294967295, %v4586_v48  ;;  %v4453_v50 = vand.u32 4294901760, %v2965_v42  ;;  %v3002_v51 = vsub.f32 %v1957_v47, %v1957_v47  ;;  %v1941_v52 = vsel %vm2997_vm8, 1.0, %v4459_v19  ;;  %2132 = vmatpush3.msk.msra.mxu0 %vm2997_vm8, %v4481_v14  ;;  %vm3014_vm11 = vmand %vm139_vm12, %vm189_vm9 }
  0x37   :  { %v4589_v53 = vsel %vm3014_vm11, 4294967295, %v4588_v53  ;;  %v4452_v54 = vand.u32 4294901760, %v2892_v28  ;;  %v87_v55 = vadd.s32 200, %v2807_v1  ;;  %v3020_v56 = vsub.f32 %v1941_v52, %v1941_v52  ;;  %2158 = vmatprep.subr.mxu1 %v587_v49  ;;  %2133 = vmatprep.subr.msk.mxu0 %vm3014_vm11, %v4481_v14  ;;  %vm3035_vm9 = vmand %vm123_vm2, %vm173_vm6 }
  0x38   :  { %v1956_v57 = vsel %vm3014_vm11, 1.0, %v4459_v19  ;;  %v474_v58 = vsub.f32 %v2965_v42, %v4453_v50  ;;  %v4591_v59 = vsel %vm3035_vm9, 4294967295, %v4590_v59  ;;  %v4451_v60 = vand.u32 4294901760, %v2910_v31  ;;  %2134 = vmatpush3.msk.msra.mxu0 %vm3035_vm9, %v4481_v14 }
  0x39   :  { %v3040_v61 = vsub.f32 %v1956_v57, %v1956_v57  ;;  %v1940_v62 = vsel %vm3035_vm9, 1.0, %v4459_v19  ;;  %v593_v63 = vsub.f32 %v2892_v28, %v4452_v54  ;;  %vm138_vm12 = vcmp.ge.s32.totalorder %v87_v55, %v2813_v4 }
  0x3a   :  { %v475_v0 = vand.u32 4294901760, %v474_v58  ;;  %v3052_v3 = vsub.f32 %v1940_v62, %v1940_v62  ;;  %vm188_vm2 = vcmp.lt.s32.totalorder %v87_v55, %v2822_v11  ;;  %v481_v5 = vsub.f32 %v2910_v31, %v4451_v60 }
  0x3b   :  { %v594_v6 = vand.u32 4294901760, %v593_v63  ;;  %vm3058_vm6 = vmand %vm138_vm12, %vm188_vm2  ;;  %v4592_v7 = vmov 0  ;;  %v71_v8 = vadd.s32 72, %v2807_v1  ;;  %v4450_v9 = vand.u32 4294901760, %v2928_v35 }
  0x3c   :  { %v4593_v7 = vsel %vm3058_vm6, 4294967295, %v4592_v7  ;;  %v86_v10 = vadd.s32 192, %v2807_v1  ;;  %2159 = vmatpush3.msra.mxu1 %v475_v0  ;;  %v1955_v12 = vsel %vm3058_vm6, 1.0, %v4459_v19  ;;  %2135 = vmatprep.subr.msk.mxu0 %vm3058_vm6, %v4481_v14  ;;  %v482_v16 = vand.u32 4294901760, %v481_v5 }
  0x3d   :  { %v4449_v17 = vand.u32 4294901760, %v2946_v38  ;;  %v70_v18 = vadd.s32 64, %v2807_v1  ;;  %2160 = vmatprep.subr.mxu1 %v594_v6  ;;  %v3073_v20 = vsub.f32 %v1955_v12, %v1955_v12  ;;  %vm122_vm7 = vcmp.ge.s32.totalorder %v71_v8, %v2813_v4 }
  0x3e   :  { %vm172_vm12 = vcmp.lt.s32.totalorder %v71_v8, %v2822_v11  ;;  %v600_v23 = vsub.f32 %v2928_v35, %v4450_v9  ;;  %2161 = vmatpush3.msra.mxu1 %v482_v16  ;;  %v4594_v24 = vmov 0  ;;  %vm137_vm6 = vcmp.ge.s32.totalorder %v86_v10, %v2813_v4 }
  0x3f   :  { %vm3080_vm2 = vmand %vm122_vm7, %vm172_vm12  ;;  %vm187_vm9 = vcmp.lt.s32.totalorder %v86_v10, %v2822_v11  ;;  %v488_v25 = vsub.f32 %v2946_v38, %v4449_v17  ;;  %vm121_vm11 = vcmp.ge.s32.totalorder %v70_v18, %v2813_v4  ;;  %v4596_v32 = vmov 0 }
  0x40   :  { %v4595_v24 = vsel %vm3080_vm2, 4294967295, %v4594_v24  ;;  %v1939_v26 = vsel %vm3080_vm2, 1.0, %v4459_v19  ;;  %2136 = vmatpush3.msk.msra.mxu0 %vm3080_vm2, %v4481_v14  ;;  %v601_v29 = vand.u32 4294901760, %v600_v23  ;;  %vm3096_vm7 = vmand %vm137_vm6, %vm187_vm9  ;;  %vm171_vm12 = vcmp.lt.s32.totalorder %v70_v18, %v2822_v11 }
  0x41   :  { %v4597_v32 = vsel %vm3096_vm7, 4294967295, %v4596_v32  ;;  %v4448_v36 = vand.u32 4294901760, %v2967_v43  ;;  %v3102_v39 = vsub.f32 %v1939_v26, %v1939_v26  ;;  %v1954_v41 = vsel %vm3096_vm7, 1.0, %v4459_v19  ;;  %2137 = vmatprep.subr.msk.mxu0 %vm3096_vm7, %v4481_v14  ;;  %vm3110_vm2 = vmand %vm121_vm11, %vm171_vm12 }
  0x42   :  { %v489_v44 = vand.u32 4294901760, %v488_v25  ;;  %v4598_v47 = vmov 0  ;;  %v85_v49 = vadd.s32 184, %v2807_v1  ;;  %2162 = vmatprep.subr.mxu1 %v601_v29  ;;  %v3115_v52 = vsub.f32 %v1954_v41, %v1954_v41  ;;  %2138 = vmatpush3.msk.msra.mxu0 %vm3110_vm2, %v4481_v14 }
  0x43   :  { %v4599_v47 = vsel %vm3110_vm2, 4294967295, %v4598_v47  ;;  %v1938_v55 = vsel %vm3110_vm2, 1.0, %v4459_v19  ;;  %v607_v57 = vsub.f32 %v2967_v43, %v4448_v36  ;;  %v4441_v58 = vand.u32 4294901760, %v2985_v46 }
  0x44   :  { %2163 = vmatpush3.msra.mxu1 %v489_v44  ;;  %v3127_v62 = vsub.f32 %v1938_v55, %v1938_v55  ;;  %vm136_vm11 = vcmp.ge.s32.totalorder %v85_v49, %v2813_v4  ;;  %vm186_vm9 = vcmp.lt.s32.totalorder %v85_v49, %v2822_v11  ;;  %v69_v63 = vadd.s32 56, %v2807_v1 }
  0x45   :  { %v608_v0 = vand.u32 4294901760, %v607_v57  ;;  %vm3132_vm6 = vmand %vm136_vm11, %vm186_vm9  ;;  %v4600_v5 = vmov 0  ;;  %v495_v6 = vsub.f32 %v2985_v46, %v4441_v58  ;;  %v4440_v8 = vand.u32 4294901760, %v3002_v51 }
  0x46   :  { %v4601_v5 = vsel %vm3132_vm6, 4294967295, %v4600_v5  ;;  %v84_v10 = vadd.s32 176, %v2807_v1  ;;  %v1953_v12 = vsel %vm3132_vm6, 1.0, %v4459_v19  ;;  %2139 = vmatprep.subr.msk.mxu0 %vm3132_vm6, %v4481_v14  ;;  %vm120_vm12 = vcmp.ge.s32.totalorder %v69_v63, %v2813_v4 }
  0x47   :  { %vm170_vm11 = vcmp.lt.s32.totalorder %v69_v63, %v2822_v11  ;;  %v4439_v16 = vand.u32 4294901760, %v3020_v56  ;;  %2164 = vmatprep.subr.mxu1 %v608_v0  ;;  %v3150_v18 = vsub.f32 %v1953_v12, %v1953_v12  ;;  %v496_v23 = vand.u32 4294901760, %v495_v6 }
  0x48   :  { %vm3152_vm9 = vmand %vm120_vm12, %vm170_vm11  ;;  %v4602_v25 = vmov 0  ;;  %v614_v26 = vsub.f32 %v3002_v51, %v4440_v8  ;;  %vm135_vm6 = vcmp.ge.s32.totalorder %v84_v10, %v2813_v4  ;;  %vm185_vm2 = vcmp.lt.s32.totalorder %v84_v10, %v2822_v11 }
  0x49   :  { %v4603_v25 = vsel %vm3152_vm9, 4294967295, %v4602_v25  ;;  %v1937_v29 = vsel %vm3152_vm9, 1.0, %v4459_v19  ;;  %2140 = vmatpush3.msk.msra.mxu0 %vm3152_vm9, %v4481_v14  ;;  %v502_v41 = vsub.f32 %v3020_v56, %v4439_v16  ;;  %v68_v44 = vadd.s32 48, %v2807_v1  ;;  %2165 = vmatpush3.msra.mxu1 %v496_v23  ;;  %vm3173_vm12 = vmand %vm135_vm6, %vm185_vm2 }
  0x4a   :  { %v3171_v49 = vsub.f32 %v1937_v29, %v1937_v29  ;;  %v615_v55 = vand.u32 4294901760, %v614_v26  ;;  %v4604_v57 = vmov 0  ;;  %v4438_v63 = vand.u32 4294901760, %v3040_v61  ;;  %2141 = vmatprep.subr.msk.mxu0 %vm3173_vm12, %v4481_v14 }
  0x4b   :  { %v4605_v57 = vsel %vm3173_vm12, 4294967295, %v4604_v57  ;;  %v83_v0 = vadd.s32 168, %v2807_v1  ;;  %v1952_v6 = vsel %vm3173_vm12, 1.0, %v4459_v19  ;;  %v503_v10 = vand.u32 4294901760, %v502_v41 }
  0x4c   :  { %vm119_vm11 = vcmp.ge.s32.totalorder %v68_v44, %v2813_v4  ;;  %vm169_vm2 = vcmp.lt.s32.totalorder %v68_v44, %v2822_v11  ;;  %2166 = vmatprep.subr.mxu1 %v615_v55  ;;  %v3187_v12 = vsub.f32 %v1952_v6, %v1952_v6  ;;  %v4606_v23 = vmov 0 }
  0x4d   :  { %vm3189_vm6 = vmand %vm119_vm11, %vm169_vm2  ;;  %v621_v26 = vsub.f32 %v3040_v61, %v4438_v63  ;;  %vm134_vm9 = vcmp.ge.s32.totalorder %v83_v0, %v2813_v4  ;;  %vm184_vm12 = vcmp.lt.s32.totalorder %v83_v0, %v2822_v11  ;;  %2167 = vmatpush3.msra.mxu1 %v503_v10  ;;  %v4609_v41 = vmov 0 }
  0x4e   :  { %v4607_v23 = vsel %vm3189_vm6, 4294967295, %v4606_v23  ;;  %v1936_v29 = vsel %vm3189_vm6, 1.0, %v4459_v19  ;;  %2142 = vmatpush3.msk.msra.mxu0 %vm3189_vm6, %v4481_v14  ;;  %vm3204_vm11 = vmand %vm134_vm9, %vm184_vm12  ;;  %v4446_v44 = vand.u32 4294901760, %v3052_v3  ;;  %v67_v55 = vadd.s32 40, %v2807_v1 }
  0x4f   :  { %4608 = vst [vmem:[#allocation20_spill] sm:$0xff] %v4607_v23  ;;  %v4610_v41 = vsel %vm3204_vm11, 4294967295, %v4609_v41  ;;  %v4447_v6 = vand.u32 4294901760, %v3073_v20  ;;  %v3211_v0 = vsub.f32 %v1936_v29, %v1936_v29  ;;  %v622_v10 = vand.u32 4294901760, %v621_v26  ;;  %2143 = vmatprep.subr.msk.mxu0 %vm3204_vm11, %v4481_v14 }
  0x50   :  { %4611 = vst [vmem:[#allocation21_spill] sm:$0xff] %v4610_v41  ;;  %v1951_v63 = vsel %vm3204_vm11, 1.0, %v4459_v19  ;;  %v82_v16 = vadd.s32 160, %v2807_v1  ;;  %v509_v58 = vsub.f32 %v3052_v3, %v4446_v44  ;;  %vm118_vm9 = vcmp.ge.s32.totalorder %v67_v55, %v2813_v4 }
  0x51   :  { %v3220_v8 = vsub.f32 %v1951_v63, %v1951_v63  ;;  %vm168_vm12 = vcmp.lt.s32.totalorder %v67_v55, %v2822_v11  ;;  %2168 = vmatprep.subr.mxu1 %v622_v10  ;;  %v4613_v26 = vmov 0  ;;  %v628_v29 = vsub.f32 %v3073_v20, %v4447_v6 }
  0x52   :  { %vm3227_vm2 = vmand %vm118_vm9, %vm168_vm12  ;;  %vm133_vm11 = vcmp.ge.s32.totalorder %v82_v16, %v2813_v4  ;;  %vm183_vm6 = vcmp.lt.s32.totalorder %v82_v16, %v2822_v11  ;;  %v4455_v63 = vand.u32 4294901760, %v3102_v39  ;;  %v510_v44 = vand.u32 4294901760, %v509_v58 }
  0x53   :  { %4612 = vst [vmem:[#allocation22_spill] sm:$0xff] %v3220_v8  ;;  %v4614_v26 = vsel %vm3227_vm2, 4294967295, %v4613_v26  ;;  %v1935_v55 = vsel %vm3227_vm2, 1.0, %v4459_v19  ;;  %2144 = vmatpush3.msk.msra.mxu0 %vm3227_vm2, %v4481_v14  ;;  %vm3243_vm9 = vmand %vm133_vm11, %vm183_vm6  ;;  %v4616_v10 = vmov 0  ;;  %v66_v6 = vadd.s32 32, %v2807_v1 }
  0x54   :  { %4615 = vst [vmem:[#allocation23_spill] sm:$0xff] %v4614_v26  ;;  %v4617_v10 = vsel %vm3243_vm9, 4294967295, %v4616_v10  ;;  %v4454_v36 = vand.u32 4294901760, %v3115_v52  ;;  %v3249_v16 = vsub.f32 %v1935_v55, %v1935_v55  ;;  %v629_v17 = vand.u32 4294901760, %v628_v29  ;;  %2145 = vmatprep.subr.msk.mxu0 %vm3243_vm9, %v4481_v14  ;;  %2169 = vmatpush3.msra.mxu1 %v510_v44 }
  0x55   :  { %4618 = vst [vmem:[#allocation24_spill] sm:$0xff] %v4617_v10  ;;  %v1950_v58 = vsel %vm3243_vm9, 1.0, %v4459_v19  ;;  %v516_v9 = vsub.f32 %v3102_v39, %v4455_v63  ;;  %vm117_vm6 = vcmp.ge.s32.totalorder %v66_v6, %v2813_v4  ;;  %vm167_vm11 = vcmp.lt.s32.totalorder %v66_v6, %v2822_v11 }
  0x56   :  { %4619 = vst [vmem:[#allocation25_spill] sm:$0xff] %v3249_v16  ;;  %v3260_v60 = vsub.f32 %v1950_v58, %v1950_v58  ;;  %v635_v29 = vsub.f32 %v3115_v52, %v4454_v36  ;;  %2170 = vmatprep.subr.mxu1 %v629_v17  ;;  %vm3267_vm12 = vmand %vm117_vm6, %vm167_vm11  ;;  %v4621_v54 = vmov 0  ;;  %v81_v50 = vadd.s32 152, %v2807_v1 }
  0x57   :  { %v517_v55 = vand.u32 4294901760, %v516_v9  ;;  %v4622_v54 = vsel %vm3267_vm12, 4294967295, %v4621_v54  ;;  %v4468_v44 = vand.u32 4294901760, %v3127_v62  ;;  %v65_v58 = vadd.s32 24, %v2807_v1  ;;  %2146 = vmatpush3.msk.msra.mxu0 %vm3267_vm12, %v4481_v14 }
  0x58   :  { %4620 = vst [vmem:[#allocation26_spill] sm:$0xff] %v3260_v60  ;;  %4623 = vst [vmem:[#allocation27_spill] sm:$0xff] %v4622_v54  ;;  %v1934_v6 = vsel %vm3267_vm12, 1.0, %v4459_v19  ;;  %v636_v17 = vand.u32 4294901760, %v635_v29  ;;  %v4467_v9 = vand.u32 4294901760, %v3150_v18  ;;  %v80_v36 = vadd.s32 144, %v2807_v1 }
  0x59   :  { %2171 = vmatpush3.msra.mxu1 %v517_v55  ;;  %v3282_v63 = vsub.f32 %v1934_v6, %v1934_v6  ;;  %vm132_vm6 = vcmp.ge.s32.totalorder %v81_v50, %v2813_v4  ;;  %vm182_vm11 = vcmp.lt.s32.totalorder %v81_v50, %v2822_v11  ;;  %v523_v34 = vsub.f32 %v3127_v62, %v4468_v44 }
  0x5a   :  { %2172 = vmatprep.subr.mxu1 %v636_v17  ;;  %vm3289_vm9 = vmand %vm132_vm6, %vm182_vm11  ;;  %v4624_v19 = vmov 0  ;;  %vm116_vm12 = vcmp.ge.s32.totalorder %v65_v58, %v2813_v4  ;;  %vm166_vm2 = vcmp.lt.s32.totalorder %v65_v58, %v2822_v11  ;;  %v642_v29 = vsub.f32 %v3150_v18, %v4467_v9 }
  0x5b   :  { %v4625_v19 = vsel %vm3289_vm9, 4294967295, %v4624_v19  ;;  %vm131_vm7 = vcmp.ge.s32.totalorder %v80_v36, %v2813_v4  ;;  %v4627_v50 = vmov 0.0   ;;  %2147 = vmatprep.subr.msk.mxu0 %vm3289_vm9, %v4481_v14  ;;  %v524_v6 = vand.u32 4294901760, %v523_v34  ;;  %vm3305_vm6 = vmand %vm116_vm12, %vm166_vm2 }
  0x5c   :  { %4626 = vst [vmem:[#allocation28_spill] sm:$0xff] %v4625_v19  ;;  %v1949_v55 = vsel %vm3289_vm9, 1.0, %v4627_v50  ;;  %v4628_v17 = vmov 0  ;;  %vm181_vm11 = vcmp.lt.s32.totalorder %v80_v36, %v2822_v11  ;;  %v4480_v58 = vand.u32 4294901760, %v3171_v49  ;;  %2148 = vmatpush3.msk.msra.mxu0 %vm3305_vm6, %v4481_v14 }
  0x5d   :  { %v4629_v17 = vsel %vm3305_vm6, 4294967295, %v4628_v17  ;;  %v3311_v9 = vsub.f32 %v1949_v55, %v1949_v55  ;;  %v1933_v44 = vsel %vm3305_vm6, 1.0, %v4627_v50  ;;  %v643_v2 = vand.u32 4294901760, %v642_v29  ;;  %vm3319_vm9 = vmand %vm131_vm7, %vm181_vm11  ;;  %2173 = vmatpush3.msra.mxu1 %v524_v6 }
  0x5e   :  { %4630 = vst [vmem:[#allocation29_spill] sm:$0xff] %v4629_v17  ;;  %v4631_v34 = vmov 0  ;;  %v64_v19 = vadd.s32 16, %v2807_v1  ;;  %v3324_v36 = vsub.f32 %v1933_v44, %v1933_v44  ;;  %v1948_v55 = vsel %vm3319_vm9, 1.0, %v4627_v50  ;;  %2149 = vmatprep.subr.msk.mxu0 %vm3319_vm9, %v4481_v14 }
  0x5f   :  { %v4632_v34 = vsel %vm3319_vm9, 4294967295, %v4631_v34  ;;  %v530_v29 = vsub.f32 %v3171_v49, %v4480_v58  ;;  %v4483_v17 = vand.u32 4294901760, %v3187_v12  ;;  %2174 = vmatprep.subr.mxu1 %v643_v2  ;;  %v3336_v54 = vsub.f32 %v1948_v55, %v1948_v55 }
  0x60   :  { %4633 = vst [vmem:[#allocation30_spill] sm:$0xff] %v4632_v34  ;;  %4634 = vst [vmem:[#allocation31_spill] sm:$0xff] %v3324_v36  ;;  %vm115_vm7 = vcmp.ge.s32.totalorder %v64_v19, %v2813_v4  ;;  %vm165_vm2 = vcmp.lt.s32.totalorder %v64_v19, %v2822_v11  ;;  %v79_v44 = vadd.s32 136, %v2807_v1  ;;  %v4635_v10 = vmov 0 }
  0x61   :  { %v531_v6 = vand.u32 4294901760, %v530_v29  ;;  %vm3341_vm12 = vmand %vm115_vm7, %vm165_vm2  ;;  %v649_v58 = vsub.f32 %v3187_v12, %v4483_v17  ;;  %v63_v2 = vadd.s32 8, %v2807_v1  ;;  %v4638_v19 = vmov 1.0  }
  0x62   :  { %v4636_v10 = vsel %vm3341_vm12, 4294967295, %v4635_v10  ;;  %v1932_v55 = vsel %vm3341_vm12, 1.0, %v4627_v50  ;;  %2150 = vmatpush3.msk.msra.mxu0 %vm3341_vm12, %v4638_v19  ;;  %vm130_vm11 = vcmp.ge.s32.totalorder %v79_v44, %v2813_v4  ;;  %vm180_vm7 = vcmp.lt.s32.totalorder %v79_v44, %v2822_v11 }
  0x63   :  { %4637 = vst [vmem:[#allocation32_spill] sm:$0xff] %v4636_v10  ;;  %v4500_v29 = vand.u32 4294901760, %v3220_v8  ;;  %2175 = vmatpush3.msra.mxu1 %v531_v6  ;;  %v3359_v17 = vsub.f32 %v1932_v55, %v1932_v55  ;;  %v650_v14 = vand.u32 4294901760, %v649_v58  ;;  %vm3361_vm2 = vmand %vm130_vm11, %vm180_vm7  ;;  %v4640_v34 = vmov 0 }
  0x64   :  { %v4641_v34 = vsel %vm3361_vm2, 4294967295, %v4640_v34  ;;  %v4643_v26 = vand.u32 4294901760, %v3211_v0  ;;  %vm114_vm12 = vcmp.ge.s32.totalorder %v63_v2, %v2813_v4  ;;  %v1947_v44 = vsel %vm3361_vm2, 1.0, %v4627_v50  ;;  %2151 = vmatprep.subr.msk.mxu0 %vm3361_vm2, %v4638_v19 }
  0x65   :  { %4639 = vst [vmem:[#allocation33_spill] sm:$0xff] %v3359_v17  ;;  %4642 = vst [vmem:[#allocation34_spill] sm:$0xff] %v4641_v34  ;;  %vm164_vm9 = vcmp.lt.s32.totalorder %v63_v2, %v2822_v11  ;;  %v656_v58 = vsub.f32 %v3220_v8, %v4500_v29  ;;  %v78_v6 = vadd.s32 128, %v2807_v1  ;;  %2176 = vmatprep.subr.mxu1 %v650_v14  ;;  %v4645_v10 = vmov 0  ;;  %v53_v2 = vld [vmem:[#allocation2] sm:$0xff]  ;;  %v55_v34 = vld [vmem:[#allocation5] sm:$0xff] }
  0x66   :  { %v537_v41 = vsub.f32 %v3211_v0, %v4643_v26  ;;  %v3380_v26 = vsub.f32 %v1947_v44, %v1947_v44  ;;  %vm3382_vm11 = vmand %vm114_vm12, %vm164_vm9  ;;  %v4505_v23 = vand.u32 4294901760, %v3249_v16  ;;  %v4648_v44 = vmov 0 }
  0x67   :  { %v4646_v10 = vsel %vm3382_vm11, 4294967295, %v4645_v10  ;;  %v1931_v29 = vsel %vm3382_vm11, 1.0, %v4627_v50  ;;  %2152 = vmatpush3.msk.msra.mxu0 %vm3382_vm11, %v4638_v19  ;;  %v657_v14 = vand.u32 4294901760, %v656_v58  ;;  %vm129_vm9 = vcmp.ge.s32.totalorder %v78_v6, %v2813_v4 }
  0x68   :  { %4644 = vst [vmem:[#allocation35_spill] sm:$0xff] %v3380_v26  ;;  %v538_v55 = vand.u32 4294901760, %v537_v41  ;;  %4647 = vst [vmem:[#allocation36_spill] sm:$0xff] %v4646_v10  ;;  %vm179_vm12 = vcmp.lt.s32.totalorder %v78_v6, %v2822_v11  ;;  %v3397_v41 = vsub.f32 %v1931_v29, %v1931_v29  ;;  %v544_v8 = vsub.f32 %v3249_v16, %v4505_v23 }
  0x69   :  { %vm3399_vm2 = vmand %vm129_vm9, %vm179_vm12  ;;  %vm163_vm7 = vcmp.lt.s32.totalorder %v2807_v1, %v2822_v11  ;;  %vm4651_vm9 = vcmp.ge.s32.totalorder %v2807_v1, %v2813_v4  ;;  %v4652_v29 = vmov 0  ;;  %v4523_v23 = vand.u32 4294901760, %v3282_v63 }
  0x6a   :  { %2177 = vmatpush3.msra.mxu1 %v538_v55  ;;  %v4649_v44 = vsel %vm3399_vm2, 4294967295, %v4648_v44  ;;  %v1946_v6 = vsel %vm3399_vm2, 1.0, %v4627_v50  ;;  %2153 = vmatprep.subr.msk.mxu0 %vm3399_vm2, %v4638_v19  ;;  %vm3418_vm12 = vmand %vm4651_vm9, %vm163_vm7  ;;  %v57_v55 = vsub.f32 %v53_v2, %v55_v34  ;;  %v545_v11 = vand.u32 4294901760, %v544_v8 }
  0x6b   :  { %4650 = vst [vmem:[#allocation37_spill] sm:$0xff] %v4649_v44  ;;  %2178 = vmatprep.subr.mxu1 %v657_v14  ;;  %v4653_v29 = vsel %vm3418_vm12, 4294967295, %v4652_v29  ;;  %v4524_v14 = vand.u32 4294901760, %v3311_v9  ;;  %v3424_v58 = vsub.f32 %v1946_v6, %v1946_v6  ;;  %v1930_v44 = vsel %vm3418_vm12, 1.0, %v4627_v50  ;;  %2154 = vmatpush3.msk.msra.mxu0 %vm3418_vm12, %v4638_v19 }
  0x6c   :  { %4654 = vst [vmem:[#allocation38_spill] sm:$0xff] %v4653_v29  ;;  %v4656_v4 = vand.u32 4294901760, %v3260_v60  ;;  %v3435_v34 = vsub.f32 %v1930_v44, %v1930_v44  ;;  %v59_v2 = vmul.f32 %v57_v55, %v57_v55  ;;  %v551_v6 = vsub.f32 %v3282_v63, %v4523_v23  ;;  %2193 = vmatprep.subr.mxu0 %v2868_v22 }
  0x6d   :  { %4655 = vst [vmem:[#allocation39_spill] sm:$0xff] %v3424_v58  ;;  %v670_v8 = vsub.f32 %v3311_v9, %v4524_v14  ;;  %2179 = vmatpush3.msra.mxu1 %v545_v11  ;;  %v4526_v29 = vand.u32 4294901760, %v3324_v36  ;;  %v4529_v10 = vand.u32 4294901760, %v3336_v54  ;;  %v4533_v14 = vand.u32 4294901760, %v3380_v26 }
  0x6e   :  { %v663_v1 = vsub.f32 %v3260_v60, %v4656_v4  ;;  %4657 = vst [vmem:[#allocation40_spill] sm:$0xff] %v3435_v34  ;;  %v4530_v4 = vand.u32 4294901760, %v3359_v17  ;;  %v356_v44 = vcombine.high %v59_v2, %v59_v2  ;;  %v3447_v55 = vand.u32 4294901760, %v59_v2 }
  0x6f   :  { %v552_v60 = vand.u32 4294901760, %v551_v6  ;;  %v671_v16 = vand.u32 4294901760, %v670_v8  ;;  %v558_v23 = vsub.f32 %v3324_v36, %v4526_v29  ;;  %v4536_v8 = vand.u32 4294901760, %v3424_v58 }
  0x70   :  { %v664_v50 = vand.u32 4294901760, %v663_v1  ;;  %4658 = vst [vmem:[#allocation41_spill] sm:$0xff] %v3447_v55  ;;  %v677_v1 = vsub.f32 %v3336_v54, %v4529_v10  ;;  %v565_v11 = vsub.f32 %v3359_v17, %v4530_v4  ;;  %v3459_v22 = vand.u32 4294901760, %v356_v44 }
  0x71   :  { %v3462_v6 = vsub.f32 %v59_v2, %v3447_v55  ;;  %v559_v29 = vand.u32 4294901760, %v558_v23  ;;  %v684_v4 = vsub.f32 %v3380_v26, %v4533_v14  ;;  %vm4660_vm7 = vnez %v4589_v53 }
  0x72   :  { %2180 = vmatprep.subr.mxu1 %v664_v50  ;;  %4659 = vst [vmem:[#allocation42_spill] sm:$0xff] %v3459_v22  ;;  %v4537_v50 = vand.u32 4294901760, %v3397_v41  ;;  %v678_v36 = vand.u32 4294901760, %v677_v1  ;;  %v566_v10 = vand.u32 4294901760, %v565_v11  ;;  %v3470_v17 = vsub.f32 %v356_v44, %v3459_v22  ;;  %695 = vmatprep.mubr.f32.mxu1 %v3459_v22 }
  0x73   :  { %2181 = vmatpush3.msra.mxu1 %v552_v60  ;;  %v4543_v60 = vand.u32 4294901760, %v3462_v6  ;;  %v685_v23 = vand.u32 4294901760, %v684_v4  ;;  %v4542_v1 = vand.u32 4294901760, %v3435_v34  ;;  %vm4661_vm9 = vnez %v4591_v59 }
  0x74   :  { %2182 = vmatprep.subr.mxu1 %v671_v16  ;;  %v572_v2 = vsub.f32 %v3397_v41, %v4537_v50  ;;  %v691_v16 = vsub.f32 %v3424_v58, %v4536_v8  ;;  %v4544_v11 = vand.u32 4294901760, %v3470_v17  ;;  %v4708_v13 = vand.u32 4294901760, %v3002_v51 }
  0x75   :  { %2183 = vmatpush3.msra.mxu1 %v559_v29  ;;  %v463_v44 = vsub.f32 %v3462_v6, %v4543_v60  ;;  %v579_v8 = vsub.f32 %v3435_v34, %v4542_v1  ;;  %v4689_v1 = vld [vmem:[#allocation35_spill] sm:$0xff]  ;;  %v4690_v60 = vld [vmem:[#allocation32_spill] sm:$0xff]  ;;  %v4709_v15 = vand.u32 4294901760, %v3020_v56  ;;  %v4710_v21 = vand.u32 4294901760, %v3040_v61 }
  0x76   :  { %2184 = vmatprep.subr.mxu1 %v678_v36  ;;  %v573_v14 = vand.u32 4294901760, %v572_v2  ;;  %v692_v26 = vand.u32 4294901760, %v691_v16  ;;  %v457_v29 = vsub.f32 %v3470_v17, %v4544_v11  ;;  %v4672_v36 = vld [vmem:[#allocation21_spill] sm:$0xff]  ;;  %v4680_v2 = vld [vmem:[#allocation27_spill] sm:$0xff]  ;;  %v4692_v11 = vld [vmem:[#allocation34_spill] sm:$0xff]  ;;  %v4711_v27 = vand.u32 4294901760, %v3052_v3 }
  0x77   :  { %2185 = vmatpush3.msra.mxu1 %v566_v10  ;;  %v464_v4 = vand.u32 4294901760, %v463_v44  ;;  %v580_v50 = vand.u32 4294901760, %v579_v8  ;;  %v4671_v10 = vld [vmem:[#allocation22_spill] sm:$0xff]  ;;  %v4678_v8 = vld [vmem:[#allocation24_spill] sm:$0xff]  ;;  %v4682_v16 = vld [vmem:[#allocation31_spill] sm:$0xff]  ;;  %v108_v33 = vadd.s32 368, %v4712_v30 }
  0x78   :  { %2186 = vmatprep.subr.mxu1 %v685_v23  ;;  %v458_v22 = vand.u32 4294901760, %v457_v29  ;;  %v4683_v23 = vld [vmem:[#allocation28_spill] sm:$0xff]  ;;  %v4686_v29 = vld [vmem:[#allocation33_spill] sm:$0xff]  ;;  %v4715_v37 = vand.u32 4294901760, %v3102_v39  ;;  %v4717_v40 = vand.u32 4294901760, %v3115_v52 }
  0x79   :  { %2187 = vmatpush3.msra.mxu1 %v573_v14  ;;  %v4675_v14 = vld [vmem:[#allocation23_spill] sm:$0xff] }
  0x7a   :  { %2188 = vmatprep.subr.mxu1 %v692_v26  ;;  %459 = vmatprep.mubr.f32.mxu0 %v458_v22  ;;  %v4669_v22 = vld [vmem:[#allocation20_spill] sm:$0xff]  ;;  %v4674_v26 = vld [vmem:[#allocation25_spill] sm:$0xff] }
  0x7b   :  { %2189 = vmatpush3.msra.mxu1 %v580_v50  ;;  %465 = vmatmul.mubr.f32.vlgmr.msra.gmra.mxu0 %v464_v4  ;;  %v4677_v50 = vld [vmem:[#allocation26_spill] sm:$0xff] }
  0x7c   :  { %697 = vmatmul.mubr.f32.vlgmr.msra.gmra.mxu1 %v3447_v55  ;;  %2228 = vmatprep.subr.msk.mxu1 %vm2834_vm10, %v4638_v19  ;;  %v4687_v4 = vld [vmem:[#allocation30_spill] sm:$0xff]  ;;  %v4700_v55 = vand.u32 4294901760, %v2892_v28 }
  0x7d   :  { %2194 = vmatpush3.msra.mxu0 %v2965_v42  ;;  %2229 = vmatpush3.msk.msra.mxu1 %vm2847_vm15, %v4638_v19 }
  0x7e   :  { %2195 = vmatprep.subr.mxu0 %v2892_v28  ;;  %2230 = vmatprep.subr.msk.mxu1 %vm2864_vm0, %v4638_v19  ;;  %v4706_v28 = vand.u32 4294901760, %v2967_v43 }
  0x7f   :  { %2196 = vmatpush3.msra.mxu0 %v2910_v31  ;;  %2231 = vmatpush3.msk.msra.mxu1 %vm2885_vm1, %v4638_v19 }
  0x80   :  { %2197 = vmatprep.subr.mxu0 %v2928_v35  ;;  %2232 = vmatprep.subr.msk.mxu1 %vm2904_vm3, %v4638_v19 }
  0x81   :  { %2198 = vmatpush3.msra.mxu0 %v2946_v38  ;;  %2233 = vmatpush3.msk.msra.mxu1 %vm2922_vm4, %v4638_v19 }
  0x82   :  { %2199 = vmatprep.subr.mxu0 %v2967_v43  ;;  %2234 = vmatprep.subr.msk.mxu1 %vm2940_vm5, %v4638_v19  ;;  %v4719_v43 = vand.u32 4294901760, %v3127_v62 }
  0x83   :  { %2200 = vmatpush3.msra.mxu0 %v2985_v46  ;;  %2235 = vmatpush3.msk.msra.mxu1 %vm2958_vm13, %v4638_v19 }
  0x84   :  { %2201 = vmatprep.subr.mxu0 %v3002_v51  ;;  %2236 = vmatprep.subr.msk.mxu1 %vm2979_vm14, %v4638_v19  ;;  %vm4662_vm14 = vnez %v4593_v7  ;;  %v107_v51 = vadd.s32 360, %v4712_v30 }
  0x85   :  { %2202 = vmatpush3.msra.mxu0 %v3020_v56  ;;  %2237 = vmatpush3.msk.msra.mxu1 %vm2997_vm8, %v4638_v19  ;;  %vm4663_vm8 = vnez %v4595_v24  ;;  %v106_v56 = vadd.s32 352, %v4712_v30 }
  0x86   :  { %2203 = vmatprep.subr.mxu0 %v3040_v61  ;;  %2238 = vmatprep.subr.msk.mxu1 %vm4660_vm7, %v4638_v19  ;;  %vm4664_vm7 = vnez %v4597_v32 }
  0x87   :  { %2204 = vmatpush3.msra.mxu0 %v3052_v3  ;;  %2239 = vmatpush3.msk.msra.mxu1 %vm4661_vm9, %v4638_v19  ;;  %vm4665_vm9 = vnez %v4599_v47  ;;  %v105_v3 = vadd.s32 344, %v4712_v30 }
  0x88   :  { %2205 = vmatprep.subr.mxu0 %v3073_v20  ;;  %2240 = vmatprep.subr.msk.mxu1 %vm4662_vm14, %v4638_v19  ;;  %vm4666_vm14 = vnez %v4601_v5 }
  0x89   :  { %2206 = vmatpush3.msra.mxu0 %v3102_v39  ;;  %2241 = vmatpush3.msk.msra.mxu1 %vm4663_vm8, %v4638_v19  ;;  %vm4667_vm8 = vnez %v4603_v25  ;;  %v4739_v39 = vmov 0.0  }
  0x8a   :  { %2207 = vmatprep.subr.mxu0 %v3115_v52  ;;  %2242 = vmatprep.subr.msk.mxu1 %vm4664_vm7, %v4638_v19  ;;  %vm4668_vm7 = vnez %v4605_v57  ;;  %v104_v52 = vadd.s32 336, %v4712_v30  ;;  %v4745_v57 = vand.u32 4294901760, %v3311_v9 }
  0x8b   :  { %2208 = vmatpush3.msra.mxu0 %v3127_v62  ;;  %2243 = vmatpush3.msk.msra.mxu1 %vm4665_vm9, %v4638_v19  ;;  %vm4670_vm9 = vnez %v4669_v22  ;;  %v4740_v62 = vand.u32 4294901760, %v4677_v50 }
  0x8c   :  { %2209 = vmatprep.subr.mxu0 %v3150_v18  ;;  %2244 = vmatprep.subr.msk.mxu1 %vm4666_vm14, %v4638_v19  ;;  %vm4673_vm14 = vnez %v4672_v36 }
  0x8d   :  { %2210 = vmatpush3.msra.mxu0 %v3171_v49  ;;  %2245 = vmatpush3.msk.msra.mxu1 %vm4667_vm8, %v4638_v19  ;;  %vm4676_vm8 = vnez %v4675_v14 }
  0x8e   :  { %2211 = vmatprep.subr.mxu0 %v3187_v12  ;;  %2246 = vmatprep.subr.msk.mxu1 %vm4668_vm7, %v4638_v19 }
  0x8f   :  { %2212 = vmatpush3.msra.mxu0 %v3211_v0  ;;  %2247 = vmatpush3.msk.msra.mxu1 %vm4670_vm9, %v4638_v19  ;;  %vm4679_vm9 = vnez %v4678_v8 }
  0x90   :  { %2213 = vmatprep.subr.mxu0 %v4671_v10  ;;  %2248 = vmatprep.subr.msk.mxu1 %vm4673_vm14, %v4638_v19  ;;  %vm4681_vm14 = vnez %v4680_v2 }
  0x91   :  { %2214 = vmatpush3.msra.mxu0 %v4674_v26  ;;  %2249 = vmatpush3.msk.msra.mxu1 %vm4676_vm8, %v4638_v19  ;;  %vm4684_vm8 = vnez %v4683_v23  ;;  %v4703_v23 = vand.u32 4294901760, %v3462_v6 }
  0x92   :  { %2215 = vmatprep.subr.mxu0 %v4677_v50  ;;  %832 = vmatprep.mubr.f32.mxu0 %v3470_v17  ;;  %v4760_v50 = vmov 0 }
  0x93   :  { %2216 = vmatpush3.msra.mxu0 %v3282_v63  ;;  %2250 = vmatprep.subr.msk.mxu1 %vm4679_vm9, %v4638_v19  ;;  %vm4688_vm9 = vnez %v4687_v4  ;;  %v4702_v4 = vand.u32 4294901760, %v2910_v31  ;;  %v4707_v31 = vand.u32 4294901760, %v2985_v46  ;;  %v4722_v46 = vld [vmem:[#allocation18_spill] sm:$0xff] }
  0x94   :  { %2217 = vmatprep.subr.mxu0 %v3311_v9  ;;  %2251 = vmatpush3.msk.msra.mxu1 %vm4681_vm14, %v4638_v19  ;;  %vm4691_vm14 = vnez %v4690_v60  ;;  %v4696_v60 = vld [vmem:[#allocation19_spill] sm:$0xff] }
  0x95   :  { %2218 = vmatpush3.msra.mxu0 %v4682_v16  ;;  %2252 = vmatprep.subr.msk.mxu1 %vm4684_vm8, %v4638_v19  ;;  %vm4693_vm8 = vnez %v4692_v11  ;;  %v4697_v44 = vand.u32 4294901760, %v4696_v60  ;;  %v4698_v11 = vand.u32 4294901760, %v2965_v42  ;;  %v4704_v60 = vand.u32 4294901760, %v2928_v35 }
  0x96   :  { %2219 = vmatprep.subr.mxu0 %v3336_v54  ;;  %2253 = vmatpush3.msk.msra.mxu1 %vm3305_vm6, %v4638_v19  ;;  %v4705_v42 = vand.u32 4294901760, %v2946_v38  ;;  %v109_v35 = vadd.s32 376, %v4712_v30  ;;  %v4713_v38 = vand.u32 4294901760, %v3073_v20 }
  0x97   :  { %2220 = vmatpush3.msra.mxu0 %v4686_v29  ;;  %2254 = vmatprep.subr.msk.mxu1 %vm4688_vm9, %v4638_v19 }
  0x98   :  { %2221 = vmatprep.subr.mxu0 %v4689_v1  ;;  %2255 = vmatpush3.msk.msra.mxu1 %vm4691_vm14, %v4638_v19 }
  0x99   :  { %2222 = vmatpush3.msra.mxu0 %v3397_v41  ;;  %2256 = vmatprep.subr.msk.mxu1 %vm4693_vm8, %v4638_v19 }
  0x9a   :  { %2223 = vmatprep.subr.mxu0 %v3424_v58  ;;  %2257 = vmatpush3.msk.msra.mxu1 %vm3382_vm11, %v4638_v19  ;;  %v4699_v58 = vld [vmem:[#allocation38_spill] sm:$0xff] }
  0x9b   :  { %2224 = vmatpush3.msra.mxu0 %v3435_v34  ;;  %2258 = vmatprep.subr.msk.mxu1 %vm3399_vm2, %v4638_v19  ;;  %v4701_v34 = vand.u32 4294901760, %v3470_v17  ;;  %v4752_v17 = vmov 0 }
  0x9c   :  { %835 = vmatmul.mubr.f32.vlgmr.msra.gmra.mxu0 %v3462_v6  ;;  %2263 = vmatprep.subr.mxu0 %v4697_v44  ;;  %v4755_v6 = vld [vmem:[#allocation42_spill] sm:$0xff] }
  0x9d   :  { %2264 = vmatpush3.msra.mxu0 %v4698_v11  ;;  %2259 = vmatpush3.msk.msra.mxu1 %vm3418_vm12, %v4638_v19  ;;  %vm4746_vm12 = vnez %v4672_v36  ;;  %v4758_v36 = vand.u32 4294901760, %v4689_v1  ;;  %v4762_v1 = vand.u32 4294901760, %v3397_v41  ;;  %v4767_v41 = vld [vmem:[#allocation39_spill] sm:$0xff] }
  0x9e   :  { %2265 = vmatprep.subr.mxu0 %v4700_v55  ;;  %939 = vmatprep.mubr.f32.mxu1 %v4701_v34  ;;  %v102_v34 = vadd.s32 320, %v4712_v30  ;;  %v4754_v55 = vand.u32 4294901760, %v3336_v54  ;;  %v4768_v44 = vand.u32 4294901760, %v4767_v41 }
  0x9f   :  { %2266 = vmatpush3.msra.mxu0 %v4702_v4  ;;  %943 = vmatmul.mubr.f32.vlgmr.msra.gmra.mxu1 %v4703_v23  ;;  %v4765_v23 = vmov 0 }
  0xa0   :  { %2267 = vmatprep.subr.mxu0 %v4704_v60  ;;  %2298 = vmatprep.subr.msk.mxu1 %vm2834_vm10, %v4638_v19  ;;  %vm4714_vm10 = vnez %v4584_v45  ;;  %v4721_v45 = vld [vmem:[#allocation17_spill] sm:$0xff]  ;;  %v100_v60 = vadd.s32 304, %v4712_v30 }
  0xa1   :  { %2268 = vmatpush3.msra.mxu0 %v4705_v42  ;;  %2299 = vmatpush3.msk.msra.mxu1 %vm2847_vm15, %v4638_v19  ;;  %vm4716_vm15 = vnez %v4587_v48  ;;  %v4723_v48 = vand.u32 4294901760, %v3150_v18  ;;  %v103_v18 = vadd.s32 328, %v4712_v30  ;;  %vm4747_vm2 = vcmp.ge.s32.totalorder %v106_v56, %v4721_v45  ;;  %v4770_v42 = vld [vmem:[#allocation40_spill] sm:$0xff] }
  0xa2   :  { %2269 = vmatprep.subr.mxu0 %v4706_v28  ;;  %2300 = vmatprep.subr.msk.mxu1 %vm2864_vm0, %v4638_v19  ;;  %vm4718_vm0 = vnez %v4589_v53  ;;  %v4725_v53 = vand.u32 4294901760, %v3171_v49  ;;  %v4771_v28 = vand.u32 4294901760, %v4770_v42 }
  0xa3   :  { %2270 = vmatpush3.msra.mxu0 %v4707_v31  ;;  %2301 = vmatpush3.msk.msra.mxu1 %vm2885_vm1, %v4638_v19  ;;  %vm4720_vm1 = vnez %v4591_v59  ;;  %v4727_v59 = vand.u32 4294901760, %v3187_v12 }
  0xa4   :  { %2271 = vmatprep.subr.mxu0 %v4708_v13  ;;  %2302 = vmatprep.subr.msk.mxu1 %vm2904_vm3, %v4638_v19  ;;  %vm160_vm3 = vcmp.ge.s32.totalorder %v109_v35, %v4721_v45 }
  0xa5   :  { %2272 = vmatpush3.msra.mxu0 %v4709_v15  ;;  %2303 = vmatpush3.msk.msra.mxu1 %vm2922_vm4, %v4638_v19  ;;  %vm210_vm4 = vcmp.lt.s32.totalorder %v109_v35, %v4722_v46  ;;  %v4774_v35 = vmov 0 }
  0xa6   :  { %2273 = vmatprep.subr.mxu0 %v4710_v21  ;;  %2304 = vmatprep.subr.msk.mxu1 %vm2940_vm5, %v4638_v19  ;;  %vm4724_vm5 = vnez %v4593_v7  ;;  %v4731_v7 = vand.u32 4294901760, %v3211_v0  ;;  %v4773_v21 = vld [vmem:[#allocation41_spill] sm:$0xff] }
  0xa7   :  { %2274 = vmatpush3.msra.mxu0 %v4711_v27  ;;  %2305 = vmatpush3.msk.msra.mxu1 %vm2958_vm13, %v4638_v19  ;;  %vm159_vm13 = vcmp.ge.s32.totalorder %v108_v33, %v4721_v45 }
  0xa8   :  { %2275 = vmatprep.subr.mxu0 %v4713_v38  ;;  %2306 = vmatprep.subr.msk.mxu1 %vm4714_vm10, %v4638_v19  ;;  %vm209_vm10 = vcmp.lt.s32.totalorder %v108_v33, %v4722_v46  ;;  %v99_v38 = vadd.s32 296, %v4712_v30 }
  0xa9   :  { %2276 = vmatpush3.msra.mxu0 %v4715_v37  ;;  %2307 = vmatpush3.msk.msra.mxu1 %vm4716_vm15, %v4638_v19  ;;  %vm4726_vm15 = vnez %v4595_v24  ;;  %v4735_v24 = vand.u32 4294901760, %v4671_v10  ;;  %v101_v10 = vadd.s32 312, %v4712_v30 }
  0xaa   :  { %2277 = vmatprep.subr.mxu0 %v4717_v40  ;;  %2308 = vmatprep.subr.msk.mxu1 %vm4718_vm0, %v4638_v19  ;;  %vm4728_vm0 = vnez %v4597_v32  ;;  %v4737_v32 = vand.u32 4294901760, %v4674_v26 }
  0xab   :  { %2278 = vmatpush3.msra.mxu0 %v4719_v43  ;;  %2309 = vmatpush3.msk.msra.mxu1 %vm4720_vm1, %v4638_v19  ;;  %vm3716_vm1 = vmand %vm160_vm3, %vm210_vm4  ;;  %vm4736_vm3 = vnez %v4601_v5  ;;  %vm158_vm4 = vcmp.ge.s32.totalorder %v107_v51, %v4721_v45 }
  0xac   :  { %2279 = vmatprep.subr.mxu0 %v4723_v48  ;;  %2310 = vmatprep.subr.msk.mxu1 %vm4724_vm5, %v4638_v19  ;;  %vm4732_vm5 = vnez %v4599_v47  ;;  %v1977_v47 = vsel %vm3716_vm1, 1.0, %v4739_v39  ;;  %v54_v48 = vld [vmem:[#allocation2 + $0x8] sm:$0xf] }
  0xad   :  { %2280 = vmatpush3.msra.mxu0 %v4725_v53  ;;  %2311 = vmatpush3.msk.msra.mxu1 %vm4726_vm15, %v4638_v19  ;;  %vm3726_vm15 = vmand %vm159_vm13, %vm209_vm10  ;;  %vm4738_vm13 = vnez %v4603_v25  ;;  %v4741_v25 = vand.u32 4294901760, %v3282_v63  ;;  %vm4742_vm10 = vnez %v4669_v22  ;;  %v3777_v12 = vsub.f32 %v1977_v47, %v1977_v47 }
  0xae   :  { %2281 = vmatprep.subr.mxu0 %v4727_v59  ;;  %2312 = vmatprep.subr.msk.mxu1 %vm4728_vm0, %v4638_v19  ;;  %vm208_vm0 = vcmp.lt.s32.totalorder %v107_v51, %v4722_v46  ;;  %v1976_v5 = vsel %vm3726_vm15, 1.0, %v4739_v39  ;;  %v4750_v63 = vand.u32 4294901760, %v4682_v16  ;;  %v4756_v22 = vand.u32 4294901760, %v4686_v29  ;;  %v56_v51 = vld [vmem:[#allocation5 + $0x8] sm:$0xf] }
  0xaf   :  { %2282 = vmatpush3.msra.mxu0 %v4731_v7  ;;  %2313 = vmatpush3.msk.msra.mxu1 %vm4732_vm5, %v4638_v19  ;;  %vm207_vm5 = vcmp.lt.s32.totalorder %v106_v56, %v4722_v46  ;;  %v3790_v9 = vsub.f32 %v1976_v5, %v1976_v5  ;;  %v58_v5 = vsub.f32 %v54_v48, %v56_v51 }
  0xb0   :  { %2283 = vmatprep.subr.mxu0 %v4735_v24  ;;  %2314 = vmatprep.subr.msk.mxu1 %vm4736_vm3, %v4638_v19  ;;  %vm156_vm3 = vcmp.ge.s32.totalorder %v105_v3, %v4721_v45 }
  0xb1   :  { %2284 = vmatpush3.msra.mxu0 %v4737_v32  ;;  %2315 = vmatpush3.msk.msra.mxu1 %vm4738_vm13, %v4638_v19  ;;  %vm206_vm13 = vcmp.lt.s32.totalorder %v105_v3, %v4722_v46  ;;  %v1321_v16 = vand.u32 4294901760, %v3790_v9  ;;  %v4778_v3 = vmov 0 }
  0xb2   :  { %2285 = vmatprep.subr.mxu0 %v4740_v62  ;;  %2316 = vmatprep.subr.msk.mxu1 %vm4668_vm7, %v4638_v19  ;;  %vm3768_vm7 = vmand %vm158_vm4, %vm208_vm0  ;;  %vm4751_vm4 = vnez %v4675_v14  ;;  %v1314_v14 = vand.u32 4294901760, %v3777_v12  ;;  %v4781_v62 = vld [vmem:[#allocation37_spill] sm:$0xff] }
  0xb3   :  { %2286 = vmatpush3.msra.mxu0 %v4741_v25  ;;  %2317 = vmatpush3.msk.msra.mxu1 %vm4742_vm10, %v4638_v19  ;;  %vm3781_vm10 = vmand %vm4747_vm2, %vm207_vm5  ;;  %vm205_vm2 = vcmp.lt.s32.totalorder %v104_v52, %v4722_v46  ;;  %v1975_v11 = vsel %vm3768_vm7, 1.0, %v4739_v39  ;;  %vm154_vm5 = vcmp.ge.s32.totalorder %v103_v18, %v4721_v45  ;;  %v1322_v40 = vsub.f32 %v3790_v9, %v1321_v16 }
  0xb4   :  { %2287 = vmatprep.subr.mxu0 %v4745_v57  ;;  %2318 = vmatprep.subr.msk.mxu1 %vm4746_vm12, %v4638_v19  ;;  %vm3792_vm0 = vmand %vm156_vm3, %vm206_vm13  ;;  %vm155_vm12 = vcmp.ge.s32.totalorder %v104_v52, %v4721_v45  ;;  %vm204_vm3 = vcmp.lt.s32.totalorder %v103_v18, %v4722_v46  ;;  %vm4757_vm13 = vnez %v4678_v8  ;;  %v1974_v54 = vsel %vm3781_vm10, 1.0, %v4739_v39  ;;  %v4763_v8 = vld [vmem:[#allocation28_spill] sm:$0xff] }
  0xb5   :  { %2288 = vmatpush3.msra.mxu0 %v4750_v63  ;;  %2319 = vmatpush3.msk.msra.mxu1 %vm4751_vm4, %v4638_v19  ;;  %v4753_v17 = vsel %vm3792_vm0, 4294967295, %v4752_v17  ;;  %vm4759_vm4 = vnez %v4680_v2  ;;  %v1973_v26 = vsel %vm3792_vm0, 1.0, %v4739_v39  ;;  %v3838_v2 = vsub.f32 %v1975_v11, %v1975_v11  ;;  %vm3843_vm0 = vmand %vm154_vm5, %vm204_vm3 }
  0xb6   :  { %2289 = vmatprep.subr.mxu0 %v4754_v55  ;;  %1109 = vmatprep.mubr.f32.mxu0 %v4755_v6  ;;  %v4766_v23 = vsel %vm3843_vm0, 4294967295, %v4765_v23  ;;  %v3854_v4 = vsub.f32 %v1974_v54, %v1974_v54  ;;  %v3862_v13 = vsub.f32 %v1973_v26, %v1973_v26  ;;  %vm152_vm5 = vcmp.ge.s32.totalorder %v101_v10, %v4721_v45 }
  0xb7   :  { %2290 = vmatpush3.msra.mxu0 %v4756_v22  ;;  %2320 = vmatprep.subr.msk.mxu1 %vm4757_vm13, %v4638_v19  ;;  %vm3829_vm13 = vmand %vm155_vm12, %vm205_vm2  ;;  %vm153_vm12 = vcmp.ge.s32.totalorder %v102_v34, %v4721_v45  ;;  %vm203_vm2 = vcmp.lt.s32.totalorder %v102_v34, %v4722_v46  ;;  %v1971_v27 = vsel %vm3843_vm0, 1.0, %v4739_v39  ;;  %v1315_v37 = vsub.f32 %v3777_v12, %v1314_v14 }
  0xb8   :  { %2291 = vmatprep.subr.mxu0 %v4758_v36  ;;  %2321 = vmatpush3.msk.msra.mxu1 %vm4759_vm4, %v4638_v19  ;;  %v4761_v50 = vsel %vm3829_vm13, 4294967295, %v4760_v50  ;;  %vm4764_vm4 = vnez %v4763_v8  ;;  %v1972_v15 = vsel %vm3829_vm13, 1.0, %v4739_v39  ;;  %v1328_v43 = vand.u32 4294901760, %v3838_v2 }
  0xb9   :  { %2292 = vmatpush3.msra.mxu0 %v4762_v1  ;;  %2322 = vmatprep.subr.msk.mxu1 %vm4764_vm4, %v4638_v19  ;;  %v3898_v56 = vsub.f32 %v1972_v15, %v1972_v15  ;;  %v1335_v59 = vand.u32 4294901760, %v3854_v4  ;;  %vm151_vm3 = vcmp.ge.s32.totalorder %v100_v60, %v4721_v45  ;;  %vm201_vm4 = vcmp.lt.s32.totalorder %v100_v60, %v4722_v46 }
  0xba   :  { %2293 = vmatprep.subr.mxu0 %v4768_v44  ;;  %2323 = vmatpush3.msk.msra.mxu1 %vm3305_vm6, %v4638_v19  ;;  %vm202_vm6 = vcmp.lt.s32.totalorder %v101_v10, %v4722_v46  ;;  %v3917_v24 = vsub.f32 %v1971_v27, %v1971_v27  ;;  %v1342_v47 = vand.u32 4294901760, %v3862_v13  ;;  %v98_v52 = vadd.s32 288, %v4712_v30 }
  0xbb   :  { %2294 = vmatpush3.msra.mxu0 %v4771_v28  ;;  %2324 = vmatprep.subr.msk.mxu1 %vm4688_vm9, %v4638_v19  ;;  %vm3876_vm9 = vmand %vm153_vm12, %vm203_vm2  ;;  %vm150_vm12 = vcmp.ge.s32.totalorder %v99_v38, %v4721_v45  ;;  %vm4783_vm2 = vnez %v4699_v58  ;;  %v1316_v18 = vand.u32 4294901760, %v1315_v37  ;;  %v1329_v25 = vsub.f32 %v3838_v2, %v1328_v43 }
  0xbc   :  { %1111 = vmatmul.mubr.f32.vlgmr.msra.gmra.mxu0 %v4773_v21  ;;  %2435 = vmatprep.subr.mxu0 %v4739_v39  ;;  %v4775_v35 = vsel %vm3876_vm9, 4294967295, %v4774_v35  ;;  %v1970_v32 = vsel %vm3876_vm9, 1.0, %v4739_v39  ;;  %v97_v58 = vadd.s32 280, %v4712_v30  ;;  %v1323_v34 = vand.u32 4294901760, %v1322_v40 }
  0xbd   :  { %2436 = vmatpush3.msk.msra.mxu0 %vm3716_vm1, %v4638_v19  ;;  %2325 = vmatpush3.msk.msra.mxu1 %vm4691_vm14, %v4638_v19  ;;  %vm3905_vm14 = vmand %vm152_vm5, %vm202_vm6  ;;  %v3953_v55 = vsub.f32 %v1970_v32, %v1970_v32  ;;  %v1336_v11 = vsub.f32 %v3854_v4, %v1335_v59  ;;  %v1349_v22 = vand.u32 4294901760, %v3898_v56  ;;  %v1343_v54 = vsub.f32 %v3862_v13, %v1342_v47 }
  0xbe   :  { %2437 = vmatprep.subr.mxu0 %v4739_v39  ;;  %2326 = vmatprep.subr.msk.mxu1 %vm4693_vm8, %v4638_v19  ;;  %v4779_v3 = vsel %vm3905_vm14, 4294967295, %v4778_v3  ;;  %vm4782_vm8 = vnez %v4781_v62  ;;  %v1969_v57 = vsel %vm3905_vm14, 1.0, %v4739_v39  ;;  %vm3946_vm5 = vmand %vm151_vm3, %vm201_vm4  ;;  %vm149_vm3 = vcmp.ge.s32.totalorder %v98_v52, %v4721_v45 }
  0xbf   :  { %2438 = vmatpush3.msk.msra.mxu0 %vm3726_vm15, %v4638_v19  ;;  %2327 = vmatpush3.msk.msra.mxu1 %vm3382_vm11, %v4638_v19  ;;  %vm200_vm11 = vcmp.lt.s32.totalorder %v99_v38, %v4722_v46  ;;  %vm199_vm4 = vcmp.lt.s32.totalorder %v98_v52, %v4722_v46  ;;  %v96_v10 = vadd.s32 272, %v4712_v30  ;;  %v3979_v36 = vsub.f32 %v1969_v57, %v1969_v57 }
  0xc0   :  { %2439 = vmatprep.subr.mxu0 %v4739_v39  ;;  %2328 = vmatprep.subr.msk.mxu1 %vm4782_vm8, %v4638_v19  ;;  %vm3970_vm6 = vmand %vm150_vm12, %vm200_vm11  ;;  %v1968_v26 = vsel %vm3946_vm5, 1.0, %v4739_v39  ;;  %v1356_v1 = vand.u32 4294901760, %v3917_v24  ;;  %v60_v8 = vmul.f32 %v58_v5, %v58_v5  ;;  %vm4788_vm8 = vnez %v4753_v17 }
  0xc1   :  { %2440 = vmatpush3.msk.msra.mxu0 %vm3768_vm7, %v4638_v19  ;;  %2329 = vmatpush3.msk.msra.mxu1 %vm4783_vm2, %v4638_v19  ;;  %v1330_v41 = vand.u32 4294901760, %v1329_v25  ;;  %v95_v44 = vadd.s32 264, %v4712_v30  ;;  %v1337_v29 = vand.u32 4294901760, %v1336_v11  ;;  %v1350_v60 = vsub.f32 %v3898_v56, %v1349_v22  ;;  %vm4003_vm2 = vmand %vm149_vm3, %vm199_vm4 }
  0xc2   :  { %2441 = vmatprep.subr.mxu0 %v4739_v39  ;;  %1213 = vmatprep.mubr.f32.mxu1 %v4755_v6  ;;  %v1967_v42 = vsel %vm3970_vm6, 1.0, %v4739_v39  ;;  %v1363_v31 = vand.u32 4294901760, %v3953_v55  ;;  %v4011_v15 = vsub.f32 %v1968_v26, %v1968_v26  ;;  %vm147_vm12 = vcmp.ge.s32.totalorder %v96_v10, %v4721_v45 }
  0xc3   :  { %2442 = vmatpush3.msk.msra.mxu0 %vm3781_vm10, %v4638_v19  ;;  %1215 = vmatmul.mubr.f32.vlgmr.msra.gmra.mxu1 %v4773_v21  ;;  %vm197_vm11 = vcmp.lt.s32.totalorder %v96_v10, %v4722_v46  ;;  %v94_v21 = vadd.s32 256, %v4712_v30  ;;  %v1344_v27 = vand.u32 4294901760, %v1343_v54  ;;  %v1357_v38 = vsub.f32 %v3917_v24, %v1356_v1 }
  0xc4   :  { %2443 = vmatprep.subr.mxu0 %v4739_v39  ;;  %2470 = vmatprep.subr.mxu1 %v4739_v39  ;;  %vm4791_vm3 = vcmp.lt.s32.totalorder %v97_v58, %v4722_v46  ;;  %vm4792_vm4 = vcmp.ge.s32.totalorder %v97_v58, %v4721_v45  ;;  %v1370_v37 = vand.u32 4294901760, %v3979_v36  ;;  %v4030_v40 = vand.u32 4294901760, %v60_v8 }
  0xc5   :  { %2444 = vmatpush3.msk.msra.mxu0 %vm4788_vm8, %v4638_v19  ;;  %2471 = vmatpush3.msra.mxu1 %v1316_v18  ;;  %v4035_v48 = vsub.f32 %v1967_v42, %v1967_v42  ;;  %v1966_v51 = vsel %vm4003_vm2, 1.0, %v4739_v39  ;;  %v1351_v53 = vand.u32 4294901760, %v1350_v60  ;;  %v1364_v7 = vsub.f32 %v3953_v55, %v1363_v31  ;;  %v1867_v18 = vld [vmem:[#allocation7] sm:$0xf] }
  0xc6   :  { %2445 = vmatprep.subr.mxu0 %v4739_v39  ;;  %2472 = vmatprep.subr.mxu1 %v4739_v39  ;;  %v1377_v62 = vand.u32 4294901760, %v4011_v15  ;;  %v4066_v5 = vsub.f32 %v1966_v51, %v1966_v51  ;;  %v4077_v25 = vsub.f32 %v60_v8, %v4030_v40  ;;  %v1358_v57 = vand.u32 4294901760, %v1357_v38 }
  0xc7   :  { %2446 = vmatpush3.msk.msra.mxu0 %vm3829_vm13, %v4638_v19  ;;  %2473 = vmatpush3.msra.mxu1 %v1323_v34  ;;  %vm4025_vm13 = vmand %vm4792_vm4, %vm4791_vm3  ;;  %vm145_vm3 = vcmp.ge.s32.totalorder %v94_v21, %v4721_v45  ;;  %vm195_vm4 = vcmp.lt.s32.totalorder %v94_v21, %v4722_v46  ;;  %v1371_v58 = vsub.f32 %v3979_v36, %v1370_v37  ;;  %v1384_v11 = vand.u32 4294901760, %v4035_v48 }
  0xc8   :  { %2447 = vmatprep.subr.mxu0 %v4739_v39  ;;  %2474 = vmatprep.subr.mxu1 %v4739_v39  ;;  %v1965_v52 = vsel %vm4025_vm13, 1.0, %v4739_v39  ;;  %v1365_v26 = vand.u32 4294901760, %v1364_v7  ;;  %v1378_v8 = vsub.f32 %v4011_v15, %v1377_v62 }
  0xc9   :  { %2448 = vmatpush3.msk.msra.mxu0 %vm3843_vm0, %v4638_v19  ;;  %2475 = vmatpush3.msra.mxu1 %v1330_v41  ;;  %vm4051_vm0 = vmand %vm147_vm12, %vm197_vm11  ;;  %vm4797_vm12 = vcmp.lt.s32.totalorder %v95_v44, %v4722_v46  ;;  %vm4798_vm11 = vcmp.ge.s32.totalorder %v95_v44, %v4721_v45  ;;  %v4091_v54 = vsub.f32 %v1965_v52, %v1965_v52  ;;  %v1303_v41 = vand.u32 4294901760, %v4077_v25 }
  0xca   :  { %2449 = vmatprep.subr.mxu0 %v4739_v39  ;;  %2476 = vmatprep.subr.mxu1 %v4739_v39  ;;  %v1964_v34 = vsel %vm4051_vm0, 1.0, %v4739_v39  ;;  %v1391_v44 = vand.u32 4294901760, %v4066_v5  ;;  %v1385_v60 = vsub.f32 %v4035_v48, %v1384_v11  ;;  %v1379_v38 = vand.u32 4294901760, %v1378_v8 }
  0xcb   :  { %2450 = vmatpush3.msk.msra.mxu0 %vm3876_vm9, %v4638_v19  ;;  %2477 = vmatpush3.msra.mxu1 %v1337_v29  ;;  %vm4072_vm9 = vmand %vm4798_vm11, %vm4797_vm12  ;;  %v4112_v45 = vsub.f32 %v1964_v34, %v1964_v34  ;;  %v1372_v29 = vand.u32 4294901760, %v1371_v58  ;;  %vm4804_vm11 = vnez %v4766_v23 }
  0xcc   :  { %2451 = vmatprep.subr.mxu0 %v4739_v39  ;;  %2478 = vmatprep.subr.mxu1 %v4739_v39  ;;  %vm4097_vm12 = vmand %vm145_vm3, %vm195_vm4  ;;  %v1963_v46 = vsel %vm4072_vm9, 1.0, %v4739_v39  ;;  %v1392_v7 = vsub.f32 %v4066_v5, %v1391_v44  ;;  %vm4559_vm3 = vmmov 0   ;;  %vm4803_vm4 = vnez %v4761_v50 }
  0xcd   :  { %2452 = vmatpush3.msk.msra.mxu0 %vm3905_vm14, %v4638_v19  ;;  %2479 = vmatpush3.msra.mxu1 %v1344_v27  ;;  %v1962_v42 = vsel %vm4097_vm12, 1.0, %v4739_v39  ;;  %v4127_v21 = vsub.f32 %v1963_v46, %v1963_v46  ;;  %v1398_v27 = vand.u32 4294901760, %v4091_v54  ;;  %v1405_v52 = vand.u32 4294901760, %v4112_v45 }
  0xce   :  { %2453 = vmatprep.subr.mxu0 %v4739_v39  ;;  %2480 = vmatprep.subr.mxu1 %v4739_v39  ;;  %v4135_v51 = vsub.f32 %v1962_v42, %v1962_v42  ;;  %v1393_v8 = vand.u32 4294901760, %v1392_v7 }
  0xcf   :  { %2454 = vmatpush3.msk.msra.mxu0 %vm3946_vm5, %v4638_v19  ;;  %2481 = vmatpush3.msra.mxu1 %v1351_v53  ;;  %v1304_v53 = vsub.f32 %v4077_v25, %v1303_v41  ;;  %v1399_v58 = vsub.f32 %v4091_v54, %v1398_v27  ;;  %v1412_v34 = vand.u32 4294901760, %v4127_v21  ;;  %v1406_v46 = vsub.f32 %v4112_v45, %v1405_v52 }
  0xd0   :  { %2455 = vmatprep.subr.mxu0 %v4739_v39  ;;  %2482 = vmatprep.subr.mxu1 %v4739_v39 }
  0xd1   :  { %2456 = vmatpush3.msk.msra.mxu0 %vm3970_vm6, %v4638_v19  ;;  %2483 = vmatpush3.msra.mxu1 %v1358_v57  ;;  %v1386_v57 = vand.u32 4294901760, %v1385_v60  ;;  %v1400_v60 = vand.u32 4294901760, %v1399_v58  ;;  %v1413_v42 = vsub.f32 %v4127_v21, %v1412_v34 }
  0xd2   :  { %2457 = vmatprep.subr.mxu0 %v4739_v39  ;;  %2484 = vmatprep.subr.mxu1 %v4739_v39 }
  0xd3   :  { %2458 = vmatpush3.msk.msra.mxu0 %vm4003_vm2, %v4638_v19  ;;  %2485 = vmatpush3.msra.mxu1 %v1365_v26  ;;  %v1305_v26 = vand.u32 4294901760, %v1304_v53  ;;  %v1414_v7 = vand.u32 4294901760, %v1413_v42 }
  0xd4   :  { %2459 = vmatprep.subr.mxu0 %v4739_v39  ;;  %2486 = vmatprep.subr.mxu1 %v4739_v39 }
  0xd5   :  { %2460 = vmatpush3.msk.msra.mxu0 %vm4025_vm13, %v4638_v19  ;;  %2487 = vmatpush3.msra.mxu1 %v1372_v29  ;;  %v1419_v29 = vand.u32 4294901760, %v4135_v51 }
  0xd6   :  { %2461 = vmatprep.subr.mxu0 %v4739_v39  ;;  %2488 = vmatprep.subr.mxu1 %v4739_v39 }
  0xd7   :  { %2462 = vmatpush3.msk.msra.mxu0 %vm4051_vm0, %v4638_v19  ;;  %2489 = vmatpush3.msra.mxu1 %v1379_v38  ;;  %v1407_v38 = vand.u32 4294901760, %v1406_v46  ;;  %v1420_v53 = vsub.f32 %v4135_v51, %v1419_v29 }
  0xd8   :  { %2463 = vmatprep.subr.mxu0 %v4739_v39  ;;  %2490 = vmatprep.subr.mxu1 %v4739_v39 }
  0xd9   :  { %2464 = vmatpush3.msk.msra.mxu0 %vm4072_vm9, %v4638_v19  ;;  %2491 = vmatpush3.msra.mxu1 %v1386_v57  ;;  %v1421_v57 = vand.u32 4294901760, %v1420_v53 }
  0xda   :  { %2465 = vmatprep.subr.mxu0 %v4739_v39  ;;  %2467 = vmatprep.mubr.msk.f32.mxu0 %vm4559_vm3, %v4739_v39 }
  0xdb   :  { %2466 = vmatpush3.msk.msra.mxu0 %vm4097_vm12, %v4638_v19  ;;  %2492 = vmatprep.subr.mxu1 %v4739_v39 }
  0xdc   :  { %2468 = vmatmul.mubr.f32.vlgmr.msra.gmra.mxu0 %v1305_v26  ;;  %2493 = vmatpush3.msra.mxu1 %v1393_v8 }
  0xdd   :  { %2505 = vmatprep.subr.mxu0 %v4739_v39  ;;  %2494 = vmatprep.subr.mxu1 %v4739_v39 }
  0xde   :  { %2506 = vmatpush3.msra.mxu0 %v3777_v12  ;;  %2495 = vmatpush3.msra.mxu1 %v1400_v60 }
  0xdf   :  { %2507 = vmatprep.subr.mxu0 %v4739_v39  ;;  %2496 = vmatprep.subr.mxu1 %v4739_v39 }
  0xe0   :  { %2508 = vmatpush3.msra.mxu0 %v3790_v9  ;;  %2497 = vmatpush3.msra.mxu1 %v1407_v38 }
  0xe1   :  { %2509 = vmatprep.subr.mxu0 %v4739_v39  ;;  %2498 = vmatprep.subr.mxu1 %v4739_v39 }
  0xe2   :  { %2510 = vmatpush3.msra.mxu0 %v3838_v2  ;;  %2499 = vmatpush3.msra.mxu1 %v1414_v7 }
  0xe3   :  { %2511 = vmatprep.subr.mxu0 %v4739_v39  ;;  %2500 = vmatprep.subr.mxu1 %v4739_v39 }
  0xe4   :  { %2512 = vmatpush3.msra.mxu0 %v3854_v4  ;;  %2501 = vmatpush3.msra.mxu1 %v1421_v57 }
  0xe5   :  { %2502 = vmatprep.mubr.msk.f32.mxu1 %vm4559_vm3, %v4739_v39  ;;  %2513 = vmatprep.subr.mxu0 %v4739_v39  ;;  %vm4805_vm3 = vnez %v4775_v35 }
  0xe6   :  { %2503 = vmatmul.mubr.f32.vlgmr.msra.gmra.mxu1 %v4030_v40  ;;  %2514 = vmatpush3.msra.mxu0 %v3862_v13 }
  0xe7   :  { %2540 = vmatprep.subr.mxu1 %v4739_v39  ;;  %2515 = vmatprep.subr.mxu0 %v4739_v39 }
  0xe8   :  { %2541 = vmatpush3.msk.msra.mxu1 %vm3716_vm1, %v4638_v19  ;;  %2516 = vmatpush3.msra.mxu0 %v3898_v56 }
  0xe9   :  { %2542 = vmatprep.subr.mxu1 %v4739_v39  ;;  %2517 = vmatprep.subr.mxu0 %v4739_v39 }
  0xea   :  { %2543 = vmatpush3.msk.msra.mxu1 %vm3726_vm15, %v4638_v19  ;;  %2518 = vmatpush3.msra.mxu0 %v3917_v24 }
  0xeb   :  { %2544 = vmatprep.subr.mxu1 %v4739_v39  ;;  %2519 = vmatprep.subr.mxu0 %v4739_v39 }
  0xec   :  { %2545 = vmatpush3.msk.msra.mxu1 %vm3768_vm7, %v4638_v19  ;;  %2520 = vmatpush3.msra.mxu0 %v3953_v55 }
  0xed   :  { %2546 = vmatprep.subr.mxu1 %v4739_v39  ;;  %2521 = vmatprep.subr.mxu0 %v4739_v39 }
  0xee   :  { %2547 = vmatpush3.msk.msra.mxu1 %vm3781_vm10, %v4638_v19  ;;  %2522 = vmatpush3.msra.mxu0 %v3979_v36 }
  0xef   :  { %2548 = vmatprep.subr.mxu1 %v4739_v39  ;;  %2523 = vmatprep.subr.mxu0 %v4739_v39 }
  0xf0   :  { %2549 = vmatpush3.msk.msra.mxu1 %vm4788_vm8, %v4638_v19  ;;  %2524 = vmatpush3.msra.mxu0 %v4011_v15 }
  0xf1   :  { %2550 = vmatprep.subr.mxu1 %v4739_v39  ;;  %2525 = vmatprep.subr.mxu0 %v4739_v39 }
  0xf2   :  { %2551 = vmatpush3.msk.msra.mxu1 %vm4803_vm4, %v4638_v19  ;;  %2526 = vmatpush3.msra.mxu0 %v4035_v48 }
  0xf3   :  { %2552 = vmatprep.subr.mxu1 %v4739_v39  ;;  %2527 = vmatprep.subr.mxu0 %v4739_v39 }
  0xf4   :  { %2553 = vmatpush3.msk.msra.mxu1 %vm4804_vm11, %v4638_v19  ;;  %2528 = vmatpush3.msra.mxu0 %v4066_v5 }
  0xf5   :  { %2554 = vmatprep.subr.mxu1 %v4739_v39  ;;  %2529 = vmatprep.subr.mxu0 %v4739_v39 }
  0xf6   :  { %2555 = vmatpush3.msk.msra.mxu1 %vm4805_vm3, %v4638_v19  ;;  %2530 = vmatpush3.msra.mxu0 %v4091_v54 }
  0xf7   :  { %2556 = vmatprep.subr.mxu1 %v4739_v39  ;;  %2531 = vmatprep.subr.mxu0 %v4739_v39 }
  0xf8   :  { %2557 = vmatpush3.msk.msra.mxu1 %vm3905_vm14, %v4638_v19  ;;  %2532 = vmatpush3.msra.mxu0 %v4112_v45  ;;  %vm4806_vm14 = vmmov 0  }
  0xf9   :  { %2558 = vmatprep.subr.mxu1 %v4739_v39  ;;  %2533 = vmatprep.subr.mxu0 %v4739_v39 }
  0xfa   :  { %2559 = vmatpush3.msk.msra.mxu1 %vm3946_vm5, %v4638_v19  ;;  %2534 = vmatpush3.msra.mxu0 %v4127_v21 }
  0xfb   :  { %2560 = vmatprep.subr.mxu1 %v4739_v39  ;;  %2535 = vmatprep.subr.mxu0 %v4739_v39 }
  0xfc   :  { %2561 = vmatpush3.msk.msra.mxu1 %vm3970_vm6, %v4638_v19  ;;  %2536 = vmatpush3.msra.mxu0 %v4135_v51 }
  0xfd   :  { %2537 = vmatprep.mubr.msk.f32.mxu0 %vm4806_vm14, %v4739_v39  ;;  %2562 = vmatprep.subr.mxu1 %v4739_v39 }
  0xfe   :  { %2538 = vmatmul.mubr.f32.vlgmr.msra.gmra.mxu0 %v4077_v25  ;;  %2563 = vmatpush3.msk.msra.mxu1 %vm4003_vm2, %v4638_v19 }
  0xff   :  { %2575 = vmatprep.subr.mxu0 %v4739_v39  ;;  %2564 = vmatprep.subr.mxu1 %v4739_v39 }
 0x100   :  { %2576 = vmatpush3.msra.mxu0 %v1314_v14  ;;  %2565 = vmatpush3.msk.msra.mxu1 %vm4025_vm13, %v4638_v19 }
 0x101   :  { %2577 = vmatprep.subr.mxu0 %v4739_v39  ;;  %2566 = vmatprep.subr.mxu1 %v4739_v39 }
 0x102   :  { %2578 = vmatpush3.msra.mxu0 %v1321_v16  ;;  %2567 = vmatpush3.msk.msra.mxu1 %vm4051_vm0, %v4638_v19 }
 0x103   :  { %2579 = vmatprep.subr.mxu0 %v4739_v39  ;;  %2568 = vmatprep.subr.mxu1 %v4739_v39 }
 0x104   :  { %2580 = vmatpush3.msra.mxu0 %v1328_v43  ;;  %2569 = vmatpush3.msk.msra.mxu1 %vm4072_vm9, %v4638_v19 }
 0x105   :  { %2581 = vmatprep.subr.mxu0 %v4739_v39  ;;  %2570 = vmatprep.subr.mxu1 %v4739_v39 }
 0x106   :  { %2582 = vmatpush3.msra.mxu0 %v1335_v59  ;;  %2571 = vmatpush3.msk.msra.mxu1 %vm4097_vm12, %v4638_v19 }
 0x107   :  { %2572 = vmatprep.mubr.msk.f32.mxu1 %vm4806_vm14, %v4739_v39  ;;  %2583 = vmatprep.subr.mxu0 %v4739_v39 }
 0x108   :  { %2573 = vmatmul.mubr.f32.vlgmr.msra.gmra.mxu1 %v1303_v41  ;;  %2584 = vmatpush3.msra.mxu0 %v1342_v47 }
 0x109   :  { %2610 = vmatprep.subr.mxu1 %v4739_v39  ;;  %2585 = vmatprep.subr.mxu0 %v4739_v39 }
 0x10a   :  { %2611 = vmatpush3.msk.msra.mxu1 %vm3716_vm1, %v4638_v19  ;;  %2586 = vmatpush3.msra.mxu0 %v1349_v22  ;;  %vm4807_vm1 = vnez %v4779_v3 }
 0x10b   :  { %2612 = vmatprep.subr.mxu1 %v4739_v39  ;;  %2587 = vmatprep.subr.mxu0 %v4739_v39 }
 0x10c   :  { %2613 = vmatpush3.msk.msra.mxu1 %vm3726_vm15, %v4638_v19  ;;  %2588 = vmatpush3.msra.mxu0 %v1356_v1 }
 0x10d   :  { %2614 = vmatprep.subr.mxu1 %v4739_v39  ;;  %2589 = vmatprep.subr.mxu0 %v4739_v39 }
 0x10e   :  { %2615 = vmatpush3.msk.msra.mxu1 %vm3768_vm7, %v4638_v19  ;;  %2590 = vmatpush3.msra.mxu0 %v1363_v31  ;;  %vm1868_vm7 = vcmp.ne.s32.totalorder %v1867_v18, 4294967295 }
 0x10f   :  { %2616 = vmatprep.subr.mxu1 %v4739_v39  ;;  %2591 = vmatprep.subr.mxu0 %v4739_v39 }
 0x110   :  { %2617 = vmatpush3.msk.msra.mxu1 %vm3781_vm10, %v4638_v19  ;;  %2592 = vmatpush3.msra.mxu0 %v1370_v37  ;;  %v1864_v37 = vmul.u32 128, %v4712_v30 }
 0x111   :  { %2618 = vmatprep.subr.mxu1 %v4739_v39  ;;  %2593 = vmatprep.subr.mxu0 %v4739_v39 }
 0x112   :  { %2619 = vmatpush3.msk.msra.mxu1 %vm4788_vm8, %v4638_v19  ;;  %2594 = vmatpush3.msra.mxu0 %v1377_v62  ;;  %v4808_v62 = vld [vmem:[#allocation16_spill] sm:$0xff] }
 0x113   :  { %2620 = vmatprep.subr.mxu1 %v4739_v39  ;;  %2595 = vmatprep.subr.mxu0 %v4739_v39  ;;  %v1865_v5 = vadd.s32 %v1864_v37, %v4808_v62 }
 0x114   :  { %2621 = vmatpush3.msk.msra.mxu1 %vm4803_vm4, %v4638_v19  ;;  %2596 = vmatpush3.msra.mxu0 %v1384_v11 }
 0x115   :  { %2622 = vmatprep.subr.mxu1 %v4739_v39  ;;  %2597 = vmatprep.subr.mxu0 %v4739_v39  ;;  %vm1866_vm15 = vcmp.lt.s32.totalorder %v1865_v5, 500 }
 0x116   :  { %2623 = vmatpush3.msk.msra.mxu1 %vm4804_vm11, %v4638_v19  ;;  %2598 = vmatpush3.msra.mxu0 %v1391_v44  ;;  %vm1869_vm10 = vmand %vm1866_vm15, %vm1868_vm7 }
 0x117   :  { %2624 = vmatprep.subr.mxu1 %v4739_v39  ;;  %2599 = vmatprep.subr.mxu0 %v4739_v39  ;;  %v2122_v21 = vsel %vm1869_vm10, 1.0, %v4739_v39 }
 0x118   :  { %2625 = vmatpush3.msk.msra.mxu1 %vm4805_vm3, %v4638_v19  ;;  %2600 = vmatpush3.msra.mxu0 %v1398_v27 }
 0x119   :  { %2626 = vmatprep.subr.mxu1 %v4739_v39  ;;  %2601 = vmatprep.subr.mxu0 %v4739_v39 }
 0x11a   :  { %2627 = vmatpush3.msk.msra.mxu1 %vm4807_vm1, %v4638_v19  ;;  %2602 = vmatpush3.msra.mxu0 %v1405_v52 }
 0x11b   :  { %2628 = vmatprep.subr.mxu1 %v4739_v39  ;;  %2603 = vmatprep.subr.mxu0 %v4739_v39 }
 0x11c   :  { %2629 = vmatpush3.msk.msra.mxu1 %vm3946_vm5, %v4638_v19  ;;  %2604 = vmatpush3.msra.mxu0 %v1412_v34 }
 0x11d   :  { %2630 = vmatprep.subr.mxu1 %v4739_v39  ;;  %2605 = vmatprep.subr.mxu0 %v4739_v39 }
 0x11e   :  { %2631 = vmatpush3.msk.msra.mxu1 %vm3970_vm6, %v4638_v19  ;;  %2606 = vmatpush3.msra.mxu0 %v1419_v29 }
 0x11f   :  { %2607 = vmatprep.mubr.msk.f32.mxu0 %vm4806_vm14, %v4739_v39  ;;  %2632 = vmatprep.subr.mxu1 %v4739_v39 }
 0x120   :  { %2608 = vmatmul.mubr.f32.vlgmr.msra.gmra.mxu0 %v4030_v40  ;;  %2633 = vmatpush3.msk.msra.mxu1 %vm4003_vm2, %v4638_v19 }
 0x121   :  { %2634 = vmatprep.subr.mxu1 %v4739_v39  ;;  %2642 = vmatprep.mubr.msk.f32.mxu1 %vm4806_vm14, %v4739_v39 }
 0x122   :  { %2635 = vmatpush3.msk.msra.mxu1 %vm4025_vm13, %v4638_v19  ;;  %vm1896_vm13 = vcmask 0  }
 0x123   :  { %2636 = vmatprep.subr.mxu1 %v4739_v39 }
 0x124   :  { %2637 = vmatpush3.msk.msra.mxu1 %vm4051_vm0, %v4638_v19  ;;  %vm1871_vm0 = vcmask 1043456  }
 0x125   :  { %2638 = vmatprep.subr.mxu1 %v4739_v39  ;;  %v1884_v27 = vsel %vm1871_vm0, %v2122_v21, 0.0 }
 0x126   :  { %2639 = vmatpush3.msk.msra.mxu1 %vm4072_vm9, %v4638_v19 }
 0x127   :  { %2640 = vmatprep.subr.mxu1 %v4739_v39 }
 0x128   :  { %2641 = vmatpush3.msk.msra.mxu1 %vm4097_vm12, %v4638_v19 }
 0x129   :  { %2643 = vmatmul.mubr.f32.vlgmr.msra.gmra.mxu1 %v4030_v40 }
 0x13b   :  { %v2155_v61 = vpop.f32.mrf.mxu0 }
 0x13c   :  { %v2190_v12 = vpop.f32.mrf.mxu1 }
 0x13d   :  { %v2156_v20 = vpop.f32.mrf.mxu0 }
 0x13e   :  { %v2157_v49 = vadd.f32 %v2156_v20, %v2155_v61  ;;  %v2191_v0 = vpop.f32.mrf.mxu1 }
 0x13f   :  { %v2192_v9 = vadd.f32 %v2191_v0, %v2190_v12 }
 0x141   :  { %v699_v50 = vadd.f32 %v2192_v9, %v2157_v49 }
 0x15c   :  { %v2225_v17 = vpop.f32.mrf.mxu0 }
 0x15e   :  { %v2226_v14 = vpop.f32.mrf.mxu0 }
 0x15f   :  { %v2227_v2 = vadd.f32 %v2226_v14, %v2225_v17  ;;  %v2260_v23 = vpop.f32.mrf.mxu1 }
 0x161   :  { %v837_v16 = vadd.f32 %v2227_v2, %v699_v50  ;;  %v2261_v4 = vpop.f32.mrf.mxu1 }
 0x162   :  { %v2262_v13 = vadd.f32 %v2261_v4, %v2260_v23 }
 0x164   :  { %v945_v56 = vadd.f32 %v2262_v13, %v837_v16 }
 0x17c   :  { %v2295_v35 = vpop.f32.mrf.mxu0 }
 0x17e   :  { %v2296_v43 = vpop.f32.mrf.mxu0 }
 0x17f   :  { %v2297_v19 = vadd.f32 %v2296_v43, %v2295_v35 }
 0x181   :  { %v1113_v59 = vadd.f32 %v2297_v19, %v945_v56 }
 0x183   :  { %v2330_v3 = vpop.f32.mrf.mxu1 }
 0x185   :  { %v2331_v24 = vpop.f32.mrf.mxu1 }
 0x186   :  { %v2332_v47 = vadd.f32 %v2331_v24, %v2330_v3 }
 0x188   :  { %v1217_v63 = vadd.f32 %v2332_v47, %v1113_v59 }
 0x19c   :  { %v1307_v55 = vpop.f32.mrf.mxu0 }
 0x19d   :  { %v1308_v22 = vadd.f32 %v1307_v55, %v1217_v63 }
 0x19e   :  { %v2469_v6 = vpop.f32.mrf.mxu0 }
 0x1a6   :  { %v1458_v36 = vpop.f32.mrf.mxu1 }
 0x1a7   :  { %v1459_v48 = vadd.f32 %v1458_v36, %v1308_v22 }
 0x1a8   :  { %v2504_v1 = vpop.f32.mrf.mxu1 }
 0x1be   :  { %v1562_v28 = vpop.f32.mrf.mxu0 }
 0x1bf   :  { %v1563_v25 = vadd.f32 %v1562_v28, %v1459_v48 }
 0x1c0   :  { %v2539_v31 = vpop.f32.mrf.mxu0 }
 0x1c8   :  { %v1651_v15 = vpop.f32.mrf.mxu1 }
 0x1c9   :  { %v1652_v11 = vadd.f32 %v1651_v15, %v1563_v25 }
 0x1ca   :  { %v2574_v33 = vpop.f32.mrf.mxu1 }
 0x1e0   :  { %v1770_v40 = vpop.f32.mrf.mxu0 }
 0x1e1   :  { %v1771_v54 = vadd.f32 %v1770_v40, %v1652_v11 }
 0x1e2   :  { %v2609_v32 = vpop.f32.mrf.mxu0 }
 0x1e9   :  { %v1857_v10 = vpop.f32.mrf.mxu1 }
 0x1ea   :  { %v1858_v45 = vadd.f32 %v1857_v10, %v1771_v54 }
 0x1eb   :  { %v2644_v41 = vpop.f32.mrf.mxu1 }
 0x1ec   :  { %v1870_v44 = vsel %vm1869_vm10, %v1858_v45, 0.0 }
 0x1ed   :  { %v1872_v30 = vsel %vm1871_vm0, %v1870_v44, 0.0 }
 0x1ee   :  { %1873 = vadd.xlane.f32.xlu0 %v1872_v30 }
 0x1f2   :  { %1885 = vadd.xlane.f32.xlu0 %v1884_v27 }
 0x277   :  { %v1874_v51 = vpop.xlane.xlu0 %1873 }
 0x278   :  { %v1875_v52 = vrot.slane %v1874_v51, 4 }
 0x27a   :  { %v1876_v58 = vadd.f32 %v1875_v52, %v1874_v51 }
 0x27b   :  { %v1886_v34 = vpop.xlane.xlu0 %1885 }
 0x27c   :  { %v1877_v26 = vrot.slane %v1876_v58, 2  ;;  %v1887_v8 = vrot.slane %v1886_v34, 4 }
 0x27e   :  { %v1888_v46 = vadd.f32 %v1887_v8, %v1886_v34  ;;  %v1878_v29 = vadd.f32 %v1877_v26, %v1876_v58 }
 0x280   :  { %v1889_v60 = vrot.slane %v1888_v46, 2  ;;  %v1879_v42 = vrot.slane %v1878_v29, 1 }
 0x282   :  { %v1890_v38 = vadd.f32 %v1889_v60, %v1888_v46  ;;  %v1880_v53 = vadd.f32 %v1879_v42, %v1878_v29 }
 0x284   :  { %2645 = vpush %v1880_v53  ;;  %v1891_v7 = vrot.slane %v1890_v38, 1 }
 0x286   :  { %v1892_v57 = vadd.f32 %v1891_v7, %v1890_v38 }
 0x288   :  { %2647 = vpush %v1892_v57 }
 0x2b5   :  { %s2646_s29 = spop %2645 }
 0x2b6   :  { %v1895_v39 = vstv %s2646_s29 }
 0x2b7   :  { %1897 = vst.msk [vmem:[#allocation8] sm:$0x1] %vm1896_vm13, %v1895_v39 }
 0x2b8   :  { %2728 = shalt.err (!%p2725_p5)
}
 0x2b9   :  { %1909 = dma.vmem_to_hbm [thread:$0]  %s1907_s2, 16, %s4420_s3, [#allocation4]  }
 0x2ba   :  { %s2648_s10 = spop %2647  ;;  %s2737_s12 = scalar_lea.vmem %s1917_s5, 16 }
 0x2bb   :  { %s1894_s11 = smul.f32 3.0, %s2648_s10  ;;  %p2738_p6 = scmp.ne.s32.totalorder %s1917_s5, %s2737_s12 }
 0x2bc   :  { %s2741_s13 = scalar_lea.vmem %s1917_s5, 32  ;;  %p2742_p7 = scmp.lt.s32.totalorder %s1917_s5, %s1917_s5 }
 0x2bd   :  { %v1898_v61 = vstv %s1894_s11  ;;  %p2743_p8 = scmp.lt.s32.totalorder %s2741_s13, %s2737_s12 }
 0x2be   :  { %1899 = vst.msk [vmem:[#allocation9] sm:$0x1] %vm1896_vm13, %v1898_v61 }
 0x2bf   :  { %p2744_p9 = por %p2743_p8, %p2742_p7 }
 0x2c1   :  { %p2745_p10 = pnand %p2744_p9, %p2738_p6 }
 0x2c3   :  { %2748 = shalt.err (!%p2745_p10)
}
 0x2c4   :  { %1919 = dma.vmem_to_hbm [thread:$0]  %s1917_s5, 16, %s4421_s4, [#allocation10]  }
 0x2c5   :  { %2761 = dma.done.wait [#allocation4], 16  }
 0x2c6   :  { %2762 = vsyncadd [#allocation4], 4294967280 }
 0x2c7   :  { %2763 = dma.done.wait [#allocation10], 16  }
 0x2c8   :  { %2764 = vsyncadd [#allocation10], 4294967280 }
 0x2c9   :  { %1926 = vsyncpa [#allocation3], 1 }
 0x2ca   :  { %1927 = vsyncpa [#allocation6], 1 }
 0x2cb   :  { %1928 = vsyncpa [#allocation4], 1 }
 0x2cc   :  { %1929 = vsyncpa [#allocation10], 1 }

</bundles_post_ra>
